<compile_context>
chip_gen: v5e
topology: v5e:2x2
jax: 0.10.0
libtpu: 0.0.40
codegen_flags: <defaults>
</compile_context>

<pallas_src>
import functools
import math

import jax
import jax.numpy as jnp
from jax.experimental import pallas as pl
from jax.experimental.pallas import tpu as pltpu

MATMUL_DTYPE = jnp.bfloat16  # MXU operand dtype; accumulation stays float32.


def _layer_norm(v, gamma, beta, eps=1e-5):
    mu = jnp.mean(v, axis=-1, keepdims=True)
    var = jnp.mean((v - mu) ** 2, axis=-1, keepdims=True)
    return (v - mu) * jax.lax.rsqrt(var + eps) * gamma + beta


# ----------------------------------------------------------------------------
# Fused kernel: all layers (MHSA + LN1 + FFN + LN2) + final LayerNorm.
# Grid: (batch, layer). The activation for the current batch element is carried
# across layer iterations in VMEM scratch `act_ref`.
# ----------------------------------------------------------------------------
def fused_encoder_kernel(
    x_ref, mb_ref,
    wq_ref, bq_ref, wk_ref, bk_ref, wv_ref, bv_ref, wo_ref, bo_ref,
    ln1g_ref, ln1b_ref,
    w1_ref, b1_ref, w2_ref, b2_ref,
    ln2g_ref, ln2b_ref,
    fing_ref, finb_ref,
    o_ref,
    act_ref,
    *, num_heads: int,
):
    layer = pl.program_id(1)
    num_layers = pl.num_programs(1)

    # Load this batch element's activations into the VMEM carry at layer 0.
    @pl.when(layer == 0)
    def _():
        act_ref[...] = x_ref[0]

    x = act_ref[...]                          # (S, D) f32
    mbias = mb_ref[0]                         # (1, S) additive mask bias (0 / -1e9)

    S, D = x.shape
    hd = D // num_heads
    scale = 1.0 / math.sqrt(hd)

    xb = x.astype(MATMUL_DTYPE)

    # ---- Q/K/V projections (bf16 MXU operands, f32 accumulate) ----
    q = jnp.dot(xb, wq_ref[0], preferred_element_type=jnp.float32) + bq_ref[0]
    k = jnp.dot(xb, wk_ref[0], preferred_element_type=jnp.float32) + bk_ref[0]
    v = jnp.dot(xb, wv_ref[0], preferred_element_type=jnp.float32) + bv_ref[0]

    # ---- head-batched scaled dot-product attention (no per-head loop) ----
    qh = jnp.swapaxes(q.reshape(S, num_heads, hd), 0, 1)   # (H, S, hd)
    kh = jnp.swapaxes(k.reshape(S, num_heads, hd), 0, 1)
    vh = jnp.swapaxes(v.reshape(S, num_heads, hd), 0, 1)

    s = jnp.einsum("hqd,hkd->hqk", qh, kh,
                   preferred_element_type=jnp.float32) * scale   # (H, S, S)
    s = s + mbias                                   # broadcast over heads & queries
    s = s - jnp.max(s, axis=-1, keepdims=True)
    p = jnp.exp(s)
    p = p * pl.reciprocal(jnp.sum(p, axis=-1, keepdims=True), approx=True)
    ctx_h = jnp.einsum("hqk,hkd->hqd", p, vh,
                       preferred_element_type=jnp.float32)       # (H, S, hd)
    ctx = jnp.swapaxes(ctx_h, 0, 1).reshape(S, D)

    attn_out = jnp.dot(ctx.astype(MATMUL_DTYPE), wo_ref[0],
                       preferred_element_type=jnp.float32) + bo_ref[0]

    # ---- residual + LayerNorm 1 (f32) ----  (dropout = identity, inference)
    y = _layer_norm(x + attn_out, ln1g_ref[0], ln1b_ref[0])

    # ---- feed-forward: Linear -> ReLU -> Linear ----
    h1 = jnp.dot(y.astype(MATMUL_DTYPE), w1_ref[0],
                 preferred_element_type=jnp.float32) + b1_ref[0]
    h1 = jnp.maximum(h1, 0.0)
    ff = jnp.dot(h1.astype(MATMUL_DTYPE), w2_ref[0],
                 preferred_element_type=jnp.float32) + b2_ref[0]

    # ---- residual + LayerNorm 2 (f32) ----
    z = _layer_norm(y + ff, ln2g_ref[0], ln2b_ref[0])
    act_ref[...] = z

    # Final encoder LayerNorm fused into the last layer iteration; the output
    # block is written back to HBM once per batch element.
    @pl.when(layer == num_layers - 1)
    def _():
        o_ref[0] = _layer_norm(z, fing_ref[...], finb_ref[...])


# ----------------------------------------------------------------------------
# Wrapper: stack per-layer params, build BlockSpecs, single pallas_call.
# ----------------------------------------------------------------------------
def encoder_forward(x, mask, layer_params, final_gamma, final_beta, num_heads):
    B, S, D = x.shape
    L = len(layer_params)
    Dff = layer_params[0]["w1"].shape[1]

    # mask: (B, S), 1 = attend, 0 = masked (keys). Built once for all layers.
    mask_bias = jnp.where(mask > 0, 0.0, -1e9).astype(jnp.float32).reshape(B, 1, S)

    def stack(name, dtype=None):
        a = jnp.stack([p[name] for p in layer_params], axis=0)
        return a.astype(dtype) if dtype is not None else a

    wq = stack("wq", MATMUL_DTYPE); bq = stack("bq")
    wk = stack("wk", MATMUL_DTYPE); bk = stack("bk")
    wv = stack("wv", MATMUL_DTYPE); bv = stack("bv")
    wo = stack("wo", MATMUL_DTYPE); bo = stack("bo")
    ln1g = stack("ln1_g"); ln1b = stack("ln1_b")
    w1 = stack("w1", MATMUL_DTYPE); b1 = stack("b1")
    w2 = stack("w2", MATMUL_DTYPE); b2 = stack("b2")
    ln2g = stack("ln2_g"); ln2b = stack("ln2_b")

    x_spec = pl.BlockSpec((1, S, D), lambda b, l: (b, 0, 0))
    mb_spec = pl.BlockSpec((1, 1, S), lambda b, l: (b, 0, 0))
    fin_spec = pl.BlockSpec((1, D), lambda b, l: (0, 0))

    def lspec(*tail):  # per-layer stacked parameter, indexed by the layer axis
        return pl.BlockSpec((1,) + tail, lambda b, l: (l,) + (0,) * len(tail))

    in_specs = [
        x_spec, mb_spec,
        lspec(D, D), lspec(1, D),      # wq, bq
        lspec(D, D), lspec(1, D),      # wk, bk
        lspec(D, D), lspec(1, D),      # wv, bv
        lspec(D, D), lspec(1, D),      # wo, bo
        lspec(1, D), lspec(1, D),      # ln1 gamma, beta
        lspec(D, Dff), lspec(1, Dff),  # w1, b1
        lspec(Dff, D), lspec(1, D),    # w2, b2
        lspec(1, D), lspec(1, D),      # ln2 gamma, beta
        fin_spec, fin_spec,            # final LN gamma, beta
    ]

    return pl.pallas_call(
        functools.partial(fused_encoder_kernel, num_heads=num_heads),
        out_shape=jax.ShapeDtypeStruct((B, S, D), jnp.float32),
        grid=(B, L),
        in_specs=in_specs,
        out_specs=x_spec,
        scratch_shapes=[pltpu.VMEM((S, D), jnp.float32)],
        compiler_params=pltpu.CompilerParams(
            dimension_semantics=("parallel", "arbitrary")),
    )(
        x, mask_bias,
        wq, bq, wk, bk, wv, bv, wo, bo,
        ln1g, ln1b, w1, b1, w2, b2, ln2g, ln2b,
        final_gamma, final_beta,
    )


# ----------------------------------------------------------------------------
# Deterministic parameter init
# ----------------------------------------------------------------------------
def init_layer_params(key, d_model, d_ff):
    ks = jax.random.split(key, 6)
    s = 0.02
    return {
        "wq": s * jax.random.normal(ks[0], (d_model, d_model), jnp.float32),
        "bq": jnp.zeros((1, d_model), jnp.float32),
        "wk": s * jax.random.normal(ks[1], (d_model, d_model), jnp.float32),
        "bk": jnp.zeros((1, d_model), jnp.float32),
        "wv": s * jax.random.normal(ks[2], (d_model, d_model), jnp.float32),
        "bv": jnp.zeros((1, d_model), jnp.float32),
        "wo": s * jax.random.normal(ks[3], (d_model, d_model), jnp.float32),
        "bo": jnp.zeros((1, d_model), jnp.float32),
        "ln1_g": jnp.ones((1, d_model), jnp.float32),
        "ln1_b": jnp.zeros((1, d_model), jnp.float32),
        "w1": s * jax.random.normal(ks[4], (d_model, d_ff), jnp.float32),
        "b1": jnp.zeros((1, d_ff), jnp.float32),
        "w2": s * jax.random.normal(ks[5], (d_ff, d_model), jnp.float32),
        "b2": jnp.zeros((1, d_model), jnp.float32),
        "ln2_g": jnp.ones((1, d_model), jnp.float32),
        "ln2_b": jnp.zeros((1, d_model), jnp.float32),
    }


if __name__ == "__main__":
    # Small shapes consistent with the module's forward
    num_layers, batch, seq_len, d_model, num_heads, d_ff = 2, 2, 8, 32, 4, 64

    key = jax.random.PRNGKey(0)
    k_x, k_params = jax.random.split(key)

    x = jax.random.normal(k_x, (batch, seq_len, d_model), jnp.float32)
    # mask: last two key positions of batch element 1 are masked out
    mask = jnp.ones((batch, seq_len), jnp.float32).at[1, -2:].set(0.0)

    layer_keys = jax.random.split(k_params, num_layers)
    layer_params = [init_layer_params(k, d_model, d_ff) for k in layer_keys]
    final_gamma = jnp.ones((1, d_model), jnp.float32)
    final_beta = jnp.zeros((1, d_model), jnp.float32)

    # TODO(synk): dropout is treated as identity (inference mode).
    out = encoder_forward(x, mask, layer_params, final_gamma, final_beta, num_heads)
    jax.block_until_ready(out)
    assert out.shape == (batch, seq_len, d_model)
    print("KERNEL_OK")
</pallas_src>

<mosaic_0001>
module attributes {stable_mosaic.version = 11 : i64} {
  func.func @fused_encoder_kernel(%arg0: i32, %arg1: i32, %arg2: memref<1x8x32xf32, #tpu.memory_space<vmem>>, %arg3: memref<1x1x8xf32, #tpu.memory_space<vmem>>, %arg4: memref<1x32x32xbf16, #tpu.memory_space<vmem>>, %arg5: memref<1x1x32xf32, #tpu.memory_space<vmem>>, %arg6: memref<1x32x32xbf16, #tpu.memory_space<vmem>>, %arg7: memref<1x1x32xf32, #tpu.memory_space<vmem>>, %arg8: memref<1x32x32xbf16, #tpu.memory_space<vmem>>, %arg9: memref<1x1x32xf32, #tpu.memory_space<vmem>>, %arg10: memref<1x32x32xbf16, #tpu.memory_space<vmem>>, %arg11: memref<1x1x32xf32, #tpu.memory_space<vmem>>, %arg12: memref<1x1x32xf32, #tpu.memory_space<vmem>>, %arg13: memref<1x1x32xf32, #tpu.memory_space<vmem>>, %arg14: memref<1x32x64xbf16, #tpu.memory_space<vmem>>, %arg15: memref<1x1x64xf32, #tpu.memory_space<vmem>>, %arg16: memref<1x64x32xbf16, #tpu.memory_space<vmem>>, %arg17: memref<1x1x32xf32, #tpu.memory_space<vmem>>, %arg18: memref<1x1x32xf32, #tpu.memory_space<vmem>>, %arg19: memref<1x1x32xf32, #tpu.memory_space<vmem>>, %arg20: memref<1x32xf32, #tpu.memory_space<vmem>>, %arg21: memref<1x32xf32, #tpu.memory_space<vmem>>, %arg22: memref<1x8x32xf32, #tpu.memory_space<vmem>>, %arg23: memref<8x32xf32, #tpu.memory_space<vmem>>) attributes {dimension_semantics = [#tpu.dimension_semantics<parallel>, #tpu.dimension_semantics<arbitrary>], iteration_bounds = array<i64: 2, 2>, scalar_prefetch = 0 : i64, scratch_operands = 1 : i64, tpu.core_type = #tpu.core_type<tc>, window_params = [{transform_indices = @transform_0, window_bounds = array<i64: 1, 8, 32>}, {transform_indices = @transform_1, window_bounds = array<i64: 1, 1, 8>}, {transform_indices = @transform_2, window_bounds = array<i64: 1, 32, 32>}, {transform_indices = @transform_3, window_bounds = array<i64: 1, 1, 32>}, {transform_indices = @transform_4, window_bounds = array<i64: 1, 32, 32>}, {transform_indices = @transform_5, window_bounds = array<i64: 1, 1, 32>}, {transform_indices = @transform_6, window_bounds = array<i64: 1, 32, 32>}, {transform_indices = @transform_7, window_bounds = array<i64: 1, 1, 32>}, {transform_indices = @transform_8, window_bounds = array<i64: 1, 32, 32>}, {transform_indices = @transform_9, window_bounds = array<i64: 1, 1, 32>}, {transform_indices = @transform_10, window_bounds = array<i64: 1, 1, 32>}, {transform_indices = @transform_11, window_bounds = array<i64: 1, 1, 32>}, {transform_indices = @transform_12, window_bounds = array<i64: 1, 32, 64>}, {transform_indices = @transform_13, window_bounds = array<i64: 1, 1, 64>}, {transform_indices = @transform_14, window_bounds = array<i64: 1, 64, 32>}, {transform_indices = @transform_15, window_bounds = array<i64: 1, 1, 32>}, {transform_indices = @transform_16, window_bounds = array<i64: 1, 1, 32>}, {transform_indices = @transform_17, window_bounds = array<i64: 1, 1, 32>}, {pipeline_mode = #tpu.pipeline_mode<synchronous>, transform_indices = @transform_18, window_bounds = array<i64: 1, 32>}, {pipeline_mode = #tpu.pipeline_mode<synchronous>, transform_indices = @transform_19, window_bounds = array<i64: 1, 32>}, {transform_indices = @transform_20, window_bounds = array<i64: 1, 8, 32>}]} {
    %c0_i32 = arith.constant 0 : i32
    %0 = arith.cmpi eq, %arg1, %c0_i32 : i32
    %1 = arith.extui %0 : i1 to i32
    %c0_i32_0 = arith.constant 0 : i32
    %2 = arith.cmpi ne, %1, %c0_i32_0 : i32
    scf.if %2 {
      %c0_77 = arith.constant 0 : index
      %c0_78 = arith.constant 0 : index
      %c0_79 = arith.constant 0 : index
      %137 = vector.load %arg2[%c0_77, %c0_78, %c0_79] : memref<1x8x32xf32, #tpu.memory_space<vmem>>, vector<1x8x32xf32>
      %138 = vector.shape_cast %137 : vector<1x8x32xf32> to vector<8x32xf32>
      %c0_80 = arith.constant 0 : index
      %c0_81 = arith.constant 0 : index
      %139 = vector.load %arg23[%c0_80, %c0_81] : memref<8x32xf32, #tpu.memory_space<vmem>>, vector<8x32xf32>
      tpu.vector_store %arg23[%c0_80, %c0_81], %138 {strides = array<i32>} : memref<8x32xf32, #tpu.memory_space<vmem>>, vector<8x32xf32>,
    } else {
    }
    %c0 = arith.constant 0 : index
    %c0_1 = arith.constant 0 : index
    %3 = vector.load %arg23[%c0, %c0_1] : memref<8x32xf32, #tpu.memory_space<vmem>>, vector<8x32xf32>
    %c0_2 = arith.constant 0 : index
    %c0_3 = arith.constant 0 : index
    %c0_4 = arith.constant 0 : index
    %4 = vector.load %arg3[%c0_2, %c0_3, %c0_4] : memref<1x1x8xf32, #tpu.memory_space<vmem>>, vector<1x1x8xf32>
    %5 = vector.shape_cast %4 : vector<1x1x8xf32> to vector<1x8xf32>
    %6 = arith.truncf %3 : vector<8x32xf32> to vector<8x32xbf16>
    %c0_5 = arith.constant 0 : index
    %c0_6 = arith.constant 0 : index
    %c0_7 = arith.constant 0 : index
    %7 = vector.load %arg4[%c0_5, %c0_6, %c0_7] : memref<1x32x32xbf16, #tpu.memory_space<vmem>>, vector<1x32x32xbf16>
    %8 = vector.shape_cast %7 : vector<1x32x32xbf16> to vector<32x32xbf16>
    %cst = arith.constant dense<0.000000e+00> : vector<8x32xf32>
    %9 = tpu.matmul %6, %8, %cst {dimension_numbers = #tpu.dot_dimension_numbers<[1], [0], [0], [1], [0, 0, 1, 1], [], []>} : vector<8x32xbf16>, vector<32x32xbf16>, vector<8x32xf32> -> vector<8x32xf32>
    %c0_8 = arith.constant 0 : index
    %c0_9 = arith.constant 0 : index
    %c0_10 = arith.constant 0 : index
    %10 = vector.load %arg5[%c0_8, %c0_9, %c0_10] : memref<1x1x32xf32, #tpu.memory_space<vmem>>, vector<1x1x32xf32>
    %11 = vector.shape_cast %10 : vector<1x1x32xf32> to vector<1x32xf32>
    %12 = vector.broadcast %11 : vector<1x32xf32> to vector<8x32xf32>
    %13 = arith.addf %9, %12 : vector<8x32xf32>
    %c0_11 = arith.constant 0 : index
    %c0_12 = arith.constant 0 : index
    %c0_13 = arith.constant 0 : index
    %14 = vector.load %arg6[%c0_11, %c0_12, %c0_13] : memref<1x32x32xbf16, #tpu.memory_space<vmem>>, vector<1x32x32xbf16>
    %15 = vector.shape_cast %14 : vector<1x32x32xbf16> to vector<32x32xbf16>
    %cst_14 = arith.constant dense<0.000000e+00> : vector<8x32xf32>
    %16 = tpu.matmul %6, %15, %cst_14 {dimension_numbers = #tpu.dot_dimension_numbers<[1], [0], [0], [1], [0, 0, 1, 1], [], []>} : vector<8x32xbf16>, vector<32x32xbf16>, vector<8x32xf32> -> vector<8x32xf32>
    %c0_15 = arith.constant 0 : index
    %c0_16 = arith.constant 0 : index
    %c0_17 = arith.constant 0 : index
    %17 = vector.load %arg7[%c0_15, %c0_16, %c0_17] : memref<1x1x32xf32, #tpu.memory_space<vmem>>, vector<1x1x32xf32>
    %18 = vector.shape_cast %17 : vector<1x1x32xf32> to vector<1x32xf32>
    %19 = vector.broadcast %18 : vector<1x32xf32> to vector<8x32xf32>
    %20 = arith.addf %16, %19 : vector<8x32xf32>
    %c0_18 = arith.constant 0 : index
    %c0_19 = arith.constant 0 : index
    %c0_20 = arith.constant 0 : index
    %21 = vector.load %arg8[%c0_18, %c0_19, %c0_20] : memref<1x32x32xbf16, #tpu.memory_space<vmem>>, vector<1x32x32xbf16>
    %22 = vector.shape_cast %21 : vector<1x32x32xbf16> to vector<32x32xbf16>
    %cst_21 = arith.constant dense<0.000000e+00> : vector<8x32xf32>
    %23 = tpu.matmul %6, %22, %cst_21 {dimension_numbers = #tpu.dot_dimension_numbers<[1], [0], [0], [1], [0, 0, 1, 1], [], []>} : vector<8x32xbf16>, vector<32x32xbf16>, vector<8x32xf32> -> vector<8x32xf32>
    %c0_22 = arith.constant 0 : index
    %c0_23 = arith.constant 0 : index
    %c0_24 = arith.constant 0 : index
    %24 = vector.load %arg9[%c0_22, %c0_23, %c0_24] : memref<1x1x32xf32, #tpu.memory_space<vmem>>, vector<1x1x32xf32>
    %25 = vector.shape_cast %24 : vector<1x1x32xf32> to vector<1x32xf32>
    %26 = vector.broadcast %25 : vector<1x32xf32> to vector<8x32xf32>
    %27 = arith.addf %23, %26 : vector<8x32xf32>
    %28 = vector.shape_cast %13 : vector<8x32xf32> to vector<8x4x8xf32>
    %29 = tpu.transpose %28, [1, 0, 2] : vector<8x4x8xf32> -> vector<4x8x8xf32>
    %30 = vector.shape_cast %20 : vector<8x32xf32> to vector<8x4x8xf32>
    %31 = tpu.transpose %30, [1, 0, 2] : vector<8x4x8xf32> -> vector<4x8x8xf32>
    %32 = vector.shape_cast %27 : vector<8x32xf32> to vector<8x4x8xf32>
    %33 = tpu.transpose %32, [1, 0, 2] : vector<8x4x8xf32> -> vector<4x8x8xf32>
    "tpu.trace_start"() <{level = 10 : i32, message = "hqd,hkd->hqk"}> : () -> ()
    %cst_25 = arith.constant dense<0.000000e+00> : vector<4x8x8xf32>
    %34 = tpu.matmul %29, %31, %cst_25 {dimension_numbers = #tpu.dot_dimension_numbers<[2], [2], [1], [1], [0, 0, 0, 1, 1, 1], [0], [0]>} : vector<4x8x8xf32>, vector<4x8x8xf32>, vector<4x8x8xf32> -> vector<4x8x8xf32>
    "tpu.trace_stop"() : () -> ()
    %cst_26 = arith.constant 0.353553385 : f32
    %35 = vector.broadcast %cst_26 : f32 to vector<4x8x8xf32>
    %36 = arith.mulf %34, %35 : vector<4x8x8xf32>
    %37 = vector.shape_cast %5 : vector<1x8xf32> to vector<1x1x8xf32>
    %38 = vector.broadcast %37 : vector<1x1x8xf32> to vector<4x8x8xf32>
    %39 = arith.addf %36, %38 : vector<4x8x8xf32>
    %cst_27 = arith.constant dense<0xFF800000> : vector<4x8xf32>
    %40 = vector.multi_reduction <maximumf>, %39, %cst_27 [2] : vector<4x8x8xf32> to vector<4x8xf32>
    %41 = vector.shape_cast %40 : vector<4x8xf32> to vector<4x8x1xf32>
    %42 = vector.broadcast %41 : vector<4x8x1xf32> to vector<4x8x8xf32>
    %43 = arith.subf %39, %42 : vector<4x8x8xf32>
    %44 = math.exp %43 : vector<4x8x8xf32>
    %cst_28 = arith.constant dense<0.000000e+00> : vector<4x8xf32>
    %45 = vector.multi_reduction <add>, %44, %cst_28 [2] : vector<4x8x8xf32> to vector<4x8xf32>
    %46 = vector.shape_cast %45 : vector<4x8xf32> to vector<4x8x1xf32>
    %47 = tpu.reciprocal %46 {approx = true} : vector<4x8x1xf32> -> vector<4x8x1xf32>
    %48 = vector.broadcast %47 : vector<4x8x1xf32> to vector<4x8x8xf32>
    %49 = arith.mulf %44, %48 : vector<4x8x8xf32>
    "tpu.trace_start"() <{level = 10 : i32, message = "hqk,hkd->hqd"}> : () -> ()
    %cst_29 = arith.constant dense<0.000000e+00> : vector<4x8x8xf32>
    %50 = tpu.matmul %49, %33, %cst_29 {dimension_numbers = #tpu.dot_dimension_numbers<[2], [1], [1], [2], [0, 0, 0, 1, 1, 2], [0], [0]>} : vector<4x8x8xf32>, vector<4x8x8xf32>, vector<4x8x8xf32> -> vector<4x8x8xf32>
    "tpu.trace_stop"() : () -> ()
    %51 = tpu.transpose %50, [1, 0, 2] : vector<4x8x8xf32> -> vector<8x4x8xf32>
    %52 = vector.shape_cast %51 : vector<8x4x8xf32> to vector<8x32xf32>
    %53 = arith.truncf %52 : vector<8x32xf32> to vector<8x32xbf16>
    %c0_30 = arith.constant 0 : index
    %c0_31 = arith.constant 0 : index
    %c0_32 = arith.constant 0 : index
    %54 = vector.load %arg10[%c0_30, %c0_31, %c0_32] : memref<1x32x32xbf16, #tpu.memory_space<vmem>>, vector<1x32x32xbf16>
    %55 = vector.shape_cast %54 : vector<1x32x32xbf16> to vector<32x32xbf16>
    %cst_33 = arith.constant dense<0.000000e+00> : vector<8x32xf32>
    %56 = tpu.matmul %53, %55, %cst_33 {dimension_numbers = #tpu.dot_dimension_numbers<[1], [0], [0], [1], [0, 0, 1, 1], [], []>} : vector<8x32xbf16>, vector<32x32xbf16>, vector<8x32xf32> -> vector<8x32xf32>
    %c0_34 = arith.constant 0 : index
    %c0_35 = arith.constant 0 : index
    %c0_36 = arith.constant 0 : index
    %57 = vector.load %arg11[%c0_34, %c0_35, %c0_36] : memref<1x1x32xf32, #tpu.memory_space<vmem>>, vector<1x1x32xf32>
    %58 = vector.shape_cast %57 : vector<1x1x32xf32> to vector<1x32xf32>
    %59 = vector.broadcast %58 : vector<1x32xf32> to vector<8x32xf32>
    %60 = arith.addf %56, %59 : vector<8x32xf32>
    %61 = arith.addf %3, %60 : vector<8x32xf32>
    %c0_37 = arith.constant 0 : index
    %c0_38 = arith.constant 0 : index
    %c0_39 = arith.constant 0 : index
    %62 = vector.load %arg12[%c0_37, %c0_38, %c0_39] : memref<1x1x32xf32, #tpu.memory_space<vmem>>, vector<1x1x32xf32>
    %63 = vector.shape_cast %62 : vector<1x1x32xf32> to vector<1x32xf32>
    %c0_40 = arith.constant 0 : index
    %c0_41 = arith.constant 0 : index
    %c0_42 = arith.constant 0 : index
    %64 = vector.load %arg13[%c0_40, %c0_41, %c0_42] : memref<1x1x32xf32, #tpu.memory_space<vmem>>, vector<1x1x32xf32>
    %65 = vector.shape_cast %64 : vector<1x1x32xf32> to vector<1x32xf32>
    %cst_43 = arith.constant dense<0.000000e+00> : vector<8xf32>
    %66 = vector.multi_reduction <add>, %61, %cst_43 [1] : vector<8x32xf32> to vector<8xf32>
    %67 = vector.shape_cast %66 : vector<8xf32> to vector<8x1xf32>
    %cst_44 = arith.constant 3.200000e+01 : f32
    %68 = vector.broadcast %cst_44 : f32 to vector<8x1xf32>
    %69 = arith.divf %67, %68 : vector<8x1xf32>
    %70 = vector.broadcast %69 : vector<8x1xf32> to vector<8x32xf32>
    %71 = arith.subf %61, %70 : vector<8x32xf32>
    %72 = arith.mulf %71, %71 : vector<8x32xf32>
    %cst_45 = arith.constant dense<0.000000e+00> : vector<8xf32>
    %73 = vector.multi_reduction <add>, %72, %cst_45 [1] : vector<8x32xf32> to vector<8xf32>
    %74 = vector.shape_cast %73 : vector<8xf32> to vector<8x1xf32>
    %cst_46 = arith.constant 3.200000e+01 : f32
    %75 = vector.broadcast %cst_46 : f32 to vector<8x1xf32>
    %76 = arith.divf %74, %75 : vector<8x1xf32>
    %77 = vector.broadcast %69 : vector<8x1xf32> to vector<8x32xf32>
    %78 = arith.subf %61, %77 : vector<8x32xf32>
    %cst_47 = arith.constant 9.99999974E-6 : f32
    %79 = vector.broadcast %cst_47 : f32 to vector<8x1xf32>
    %80 = arith.addf %76, %79 : vector<8x1xf32>
    %81 = math.rsqrt %80 : vector<8x1xf32>
    %82 = vector.broadcast %81 : vector<8x1xf32> to vector<8x32xf32>
    %83 = arith.mulf %78, %82 : vector<8x32xf32>
    %84 = vector.broadcast %63 : vector<1x32xf32> to vector<8x32xf32>
    %85 = arith.mulf %83, %84 : vector<8x32xf32>
    %86 = vector.broadcast %65 : vector<1x32xf32> to vector<8x32xf32>
    %87 = arith.addf %85, %86 : vector<8x32xf32>
    %88 = arith.truncf %87 : vector<8x32xf32> to vector<8x32xbf16>
    %c0_48 = arith.constant 0 : index
    %c0_49 = arith.constant 0 : index
    %c0_50 = arith.constant 0 : index
    %89 = vector.load %arg14[%c0_48, %c0_49, %c0_50] : memref<1x32x64xbf16, #tpu.memory_space<vmem>>, vector<1x32x64xbf16>
    %90 = vector.shape_cast %89 : vector<1x32x64xbf16> to vector<32x64xbf16>
    %cst_51 = arith.constant dense<0.000000e+00> : vector<8x64xf32>
    %91 = tpu.matmul %88, %90, %cst_51 {dimension_numbers = #tpu.dot_dimension_numbers<[1], [0], [0], [1], [0, 0, 1, 1], [], []>} : vector<8x32xbf16>, vector<32x64xbf16>, vector<8x64xf32> -> vector<8x64xf32>
    %c0_52 = arith.constant 0 : index
    %c0_53 = arith.constant 0 : index
    %c0_54 = arith.constant 0 : index
    %92 = vector.load %arg15[%c0_52, %c0_53, %c0_54] : memref<1x1x64xf32, #tpu.memory_space<vmem>>, vector<1x1x64xf32>
    %93 = vector.shape_cast %92 : vector<1x1x64xf32> to vector<1x64xf32>
    %94 = vector.broadcast %93 : vector<1x64xf32> to vector<8x64xf32>
    %95 = arith.addf %91, %94 : vector<8x64xf32>
    %cst_55 = arith.constant 0.000000e+00 : f32
    %96 = vector.broadcast %cst_55 : f32 to vector<8x64xf32>
    %97 = arith.maximumf %95, %96 : vector<8x64xf32>
    %98 = arith.truncf %97 : vector<8x64xf32> to vector<8x64xbf16>
    %c0_56 = arith.constant 0 : index
    %c0_57 = arith.constant 0 : index
    %c0_58 = arith.constant 0 : index
    %99 = vector.load %arg16[%c0_56, %c0_57, %c0_58] : memref<1x64x32xbf16, #tpu.memory_space<vmem>>, vector<1x64x32xbf16>
    %100 = vector.shape_cast %99 : vector<1x64x32xbf16> to vector<64x32xbf16>
    %cst_59 = arith.constant dense<0.000000e+00> : vector<8x32xf32>
    %101 = tpu.matmul %98, %100, %cst_59 {dimension_numbers = #tpu.dot_dimension_numbers<[1], [0], [0], [1], [0, 0, 1, 1], [], []>} : vector<8x64xbf16>, vector<64x32xbf16>, vector<8x32xf32> -> vector<8x32xf32>
    %c0_60 = arith.constant 0 : index
    %c0_61 = arith.constant 0 : index
    %c0_62 = arith.constant 0 : index
    %102 = vector.load %arg17[%c0_60, %c0_61, %c0_62] : memref<1x1x32xf32, #tpu.memory_space<vmem>>, vector<1x1x32xf32>
    %103 = vector.shape_cast %102 : vector<1x1x32xf32> to vector<1x32xf32>
    %104 = vector.broadcast %103 : vector<1x32xf32> to vector<8x32xf32>
    %105 = arith.addf %101, %104 : vector<8x32xf32>
    %106 = arith.addf %87, %105 : vector<8x32xf32>
    %c0_63 = arith.constant 0 : index
    %c0_64 = arith.constant 0 : index
    %c0_65 = arith.constant 0 : index
    %107 = vector.load %arg18[%c0_63, %c0_64, %c0_65] : memref<1x1x32xf32, #tpu.memory_space<vmem>>, vector<1x1x32xf32>
    %108 = vector.shape_cast %107 : vector<1x1x32xf32> to vector<1x32xf32>
    %c0_66 = arith.constant 0 : index
    %c0_67 = arith.constant 0 : index
    %c0_68 = arith.constant 0 : index
    %109 = vector.load %arg19[%c0_66, %c0_67, %c0_68] : memref<1x1x32xf32, #tpu.memory_space<vmem>>, vector<1x1x32xf32>
    %110 = vector.shape_cast %109 : vector<1x1x32xf32> to vector<1x32xf32>
    %cst_69 = arith.constant dense<0.000000e+00> : vector<8xf32>
    %111 = vector.multi_reduction <add>, %106, %cst_69 [1] : vector<8x32xf32> to vector<8xf32>
    %112 = vector.shape_cast %111 : vector<8xf32> to vector<8x1xf32>
    %cst_70 = arith.constant 3.200000e+01 : f32
    %113 = vector.broadcast %cst_70 : f32 to vector<8x1xf32>
    %114 = arith.divf %112, %113 : vector<8x1xf32>
    %115 = vector.broadcast %114 : vector<8x1xf32> to vector<8x32xf32>
    %116 = arith.subf %106, %115 : vector<8x32xf32>
    %117 = arith.mulf %116, %116 : vector<8x32xf32>
    %cst_71 = arith.constant dense<0.000000e+00> : vector<8xf32>
    %118 = vector.multi_reduction <add>, %117, %cst_71 [1] : vector<8x32xf32> to vector<8xf32>
    %119 = vector.shape_cast %118 : vector<8xf32> to vector<8x1xf32>
    %cst_72 = arith.constant 3.200000e+01 : f32
    %120 = vector.broadcast %cst_72 : f32 to vector<8x1xf32>
    %121 = arith.divf %119, %120 : vector<8x1xf32>
    %122 = vector.broadcast %114 : vector<8x1xf32> to vector<8x32xf32>
    %123 = arith.subf %106, %122 : vector<8x32xf32>
    %cst_73 = arith.constant 9.99999974E-6 : f32
    %124 = vector.broadcast %cst_73 : f32 to vector<8x1xf32>
    %125 = arith.addf %121, %124 : vector<8x1xf32>
    %126 = math.rsqrt %125 : vector<8x1xf32>
    %127 = vector.broadcast %126 : vector<8x1xf32> to vector<8x32xf32>
    %128 = arith.mulf %123, %127 : vector<8x32xf32>
    %129 = vector.broadcast %108 : vector<1x32xf32> to vector<8x32xf32>
    %130 = arith.mulf %128, %129 : vector<8x32xf32>
    %131 = vector.broadcast %110 : vector<1x32xf32> to vector<8x32xf32>
    %132 = arith.addf %130, %131 : vector<8x32xf32>
    %c0_74 = arith.constant 0 : index
    %c0_75 = arith.constant 0 : index
    %133 = vector.load %arg23[%c0_74, %c0_75] : memref<8x32xf32, #tpu.memory_space<vmem>>, vector<8x32xf32>
    tpu.vector_store %arg23[%c0_74, %c0_75], %132 {strides = array<i32>} : memref<8x32xf32, #tpu.memory_space<vmem>>, vector<8x32xf32>,
    %c1_i32 = arith.constant 1 : i32
    %134 = arith.cmpi eq, %arg1, %c1_i32 : i32
    %135 = arith.extui %134 : i1 to i32
    %c0_i32_76 = arith.constant 0 : i32
    %136 = arith.cmpi ne, %135, %c0_i32_76 : i32
    scf.if %136 {
      %c0_77 = arith.constant 0 : index
      %c0_78 = arith.constant 0 : index
      %137 = vector.load %arg20[%c0_77, %c0_78] : memref<1x32xf32, #tpu.memory_space<vmem>>, vector<1x32xf32>
      %c0_79 = arith.constant 0 : index
      %c0_80 = arith.constant 0 : index
      %138 = vector.load %arg21[%c0_79, %c0_80] : memref<1x32xf32, #tpu.memory_space<vmem>>, vector<1x32xf32>
      %cst_81 = arith.constant dense<0.000000e+00> : vector<8xf32>
      %139 = vector.multi_reduction <add>, %132, %cst_81 [1] : vector<8x32xf32> to vector<8xf32>
      %140 = vector.shape_cast %139 : vector<8xf32> to vector<8x1xf32>
      %cst_82 = arith.constant 3.200000e+01 : f32
      %141 = vector.broadcast %cst_82 : f32 to vector<8x1xf32>
      %142 = arith.divf %140, %141 : vector<8x1xf32>
      %143 = vector.broadcast %142 : vector<8x1xf32> to vector<8x32xf32>
      %144 = arith.subf %132, %143 : vector<8x32xf32>
      %145 = arith.mulf %144, %144 : vector<8x32xf32>
      %cst_83 = arith.constant dense<0.000000e+00> : vector<8xf32>
      %146 = vector.multi_reduction <add>, %145, %cst_83 [1] : vector<8x32xf32> to vector<8xf32>
      %147 = vector.shape_cast %146 : vector<8xf32> to vector<8x1xf32>
      %cst_84 = arith.constant 3.200000e+01 : f32
      %148 = vector.broadcast %cst_84 : f32 to vector<8x1xf32>
      %149 = arith.divf %147, %148 : vector<8x1xf32>
      %150 = vector.broadcast %142 : vector<8x1xf32> to vector<8x32xf32>
      %151 = arith.subf %132, %150 : vector<8x32xf32>
      %cst_85 = arith.constant 9.99999974E-6 : f32
      %152 = vector.broadcast %cst_85 : f32 to vector<8x1xf32>
      %153 = arith.addf %149, %152 : vector<8x1xf32>
      %154 = math.rsqrt %153 : vector<8x1xf32>
      %155 = vector.broadcast %154 : vector<8x1xf32> to vector<8x32xf32>
      %156 = arith.mulf %151, %155 : vector<8x32xf32>
      %157 = vector.broadcast %137 : vector<1x32xf32> to vector<8x32xf32>
      %158 = arith.mulf %156, %157 : vector<8x32xf32>
      %159 = vector.broadcast %138 : vector<1x32xf32> to vector<8x32xf32>
      %160 = arith.addf %158, %159 : vector<8x32xf32>
      %c0_86 = arith.constant 0 : index
      %c0_87 = arith.constant 0 : index
      %c0_88 = arith.constant 0 : index
      %161 = vector.load %arg22[%c0_86, %c0_87, %c0_88] : memref<1x8x32xf32, #tpu.memory_space<vmem>>, vector<1x8x32xf32>
      %162 = vector.shape_cast %161 : vector<1x8x32xf32> to vector<8x32xf32>
      %163 = vector.shape_cast %160 : vector<8x32xf32> to vector<1x8x32xf32>
      tpu.vector_store %arg22[%c0_86, %c0_87, %c0_88], %163 {strides = array<i32>} : memref<1x8x32xf32, #tpu.memory_space<vmem>>, vector<1x8x32xf32>,
    } else {
    }
    return
  }
  func.func @transform_0(%arg0: i32, %arg1: i32) -> (i32, i32, i32) {
    %c0_i32 = arith.constant 0 : i32
    %c0_i32_0 = arith.constant 0 : i32
    %c0_i32_1 = arith.constant 0 : i32
    return %arg0, %c0_i32, %c0_i32_0 : i32, i32, i32
  }
  func.func @transform_1(%arg0: i32, %arg1: i32) -> (i32, i32, i32) {
    %c0_i32 = arith.constant 0 : i32
    %c0_i32_0 = arith.constant 0 : i32
    %c0_i32_1 = arith.constant 0 : i32
    return %arg0, %c0_i32, %c0_i32_0 : i32, i32, i32
  }
  func.func @transform_2(%arg0: i32, %arg1: i32) -> (i32, i32, i32) {
    %c0_i32 = arith.constant 0 : i32
    %c0_i32_0 = arith.constant 0 : i32
    %c0_i32_1 = arith.constant 0 : i32
    return %arg1, %c0_i32, %c0_i32_0 : i32, i32, i32
  }
  func.func @transform_3(%arg0: i32, %arg1: i32) -> (i32, i32, i32) {
    %c0_i32 = arith.constant 0 : i32
    %c0_i32_0 = arith.constant 0 : i32
    %c0_i32_1 = arith.constant 0 : i32
    return %arg1, %c0_i32, %c0_i32_0 : i32, i32, i32
  }
  func.func @transform_4(%arg0: i32, %arg1: i32) -> (i32, i32, i32) {
    %c0_i32 = arith.constant 0 : i32
    %c0_i32_0 = arith.constant 0 : i32
    %c0_i32_1 = arith.constant 0 : i32
    return %arg1, %c0_i32, %c0_i32_0 : i32, i32, i32
  }
  func.func @transform_5(%arg0: i32, %arg1: i32) -> (i32, i32, i32) {
    %c0_i32 = arith.constant 0 : i32
    %c0_i32_0 = arith.constant 0 : i32
    %c0_i32_1 = arith.constant 0 : i32
    return %arg1, %c0_i32, %c0_i32_0 : i32, i32, i32
  }
  func.func @transform_6(%arg0: i32, %arg1: i32) -> (i32, i32, i32) {
    %c0_i32 = arith.constant 0 : i32
    %c0_i32_0 = arith.constant 0 : i32
    %c0_i32_1 = arith.constant 0 : i32
    return %arg1, %c0_i32, %c0_i32_0 : i32, i32, i32
  }
  func.func @transform_7(%arg0: i32, %arg1: i32) -> (i32, i32, i32) {
    %c0_i32 = arith.constant 0 : i32
    %c0_i32_0 = arith.constant 0 : i32
    %c0_i32_1 = arith.constant 0 : i32
    return %arg1, %c0_i32, %c0_i32_0 : i32, i32, i32
  }
  func.func @transform_8(%arg0: i32, %arg1: i32) -> (i32, i32, i32) {
    %c0_i32 = arith.constant 0 : i32
    %c0_i32_0 = arith.constant 0 : i32
    %c0_i32_1 = arith.constant 0 : i32
    return %arg1, %c0_i32, %c0_i32_0 : i32, i32, i32
  }
  func.func @transform_9(%arg0: i32, %arg1: i32) -> (i32, i32, i32) {
    %c0_i32 = arith.constant 0 : i32
    %c0_i32_0 = arith.constant 0 : i32
    %c0_i32_1 = arith.constant 0 : i32
    return %arg1, %c0_i32, %c0_i32_0 : i32, i32, i32
  }
  func.func @transform_10(%arg0: i32, %arg1: i32) -> (i32, i32, i32) {
    %c0_i32 = arith.constant 0 : i32
    %c0_i32_0 = arith.constant 0 : i32
    %c0_i32_1 = arith.constant 0 : i32
    return %arg1, %c0_i32, %c0_i32_0 : i32, i32, i32
  }
  func.func @transform_11(%arg0: i32, %arg1: i32) -> (i32, i32, i32) {
    %c0_i32 = arith.constant 0 : i32
    %c0_i32_0 = arith.constant 0 : i32
    %c0_i32_1 = arith.constant 0 : i32
    return %arg1, %c0_i32, %c0_i32_0 : i32, i32, i32
  }
  func.func @transform_12(%arg0: i32, %arg1: i32) -> (i32, i32, i32) {
    %c0_i32 = arith.constant 0 : i32
    %c0_i32_0 = arith.constant 0 : i32
    %c0_i32_1 = arith.constant 0 : i32
    return %arg1, %c0_i32, %c0_i32_0 : i32, i32, i32
  }
  func.func @transform_13(%arg0: i32, %arg1: i32) -> (i32, i32, i32) {
    %c0_i32 = arith.constant 0 : i32
    %c0_i32_0 = arith.constant 0 : i32
    %c0_i32_1 = arith.constant 0 : i32
    return %arg1, %c0_i32, %c0_i32_0 : i32, i32, i32
  }
  func.func @transform_14(%arg0: i32, %arg1: i32) -> (i32, i32, i32) {
    %c0_i32 = arith.constant 0 : i32
    %c0_i32_0 = arith.constant 0 : i32
    %c0_i32_1 = arith.constant 0 : i32
    return %arg1, %c0_i32, %c0_i32_0 : i32, i32, i32
  }
  func.func @transform_15(%arg0: i32, %arg1: i32) -> (i32, i32, i32) {
    %c0_i32 = arith.constant 0 : i32
    %c0_i32_0 = arith.constant 0 : i32
    %c0_i32_1 = arith.constant 0 : i32
    return %arg1, %c0_i32, %c0_i32_0 : i32, i32, i32
  }
  func.func @transform_16(%arg0: i32, %arg1: i32) -> (i32, i32, i32) {
    %c0_i32 = arith.constant 0 : i32
    %c0_i32_0 = arith.constant 0 : i32
    %c0_i32_1 = arith.constant 0 : i32
    return %arg1, %c0_i32, %c0_i32_0 : i32, i32, i32
  }
  func.func @transform_17(%arg0: i32, %arg1: i32) -> (i32, i32, i32) {
    %c0_i32 = arith.constant 0 : i32
    %c0_i32_0 = arith.constant 0 : i32
    %c0_i32_1 = arith.constant 0 : i32
    return %arg1, %c0_i32, %c0_i32_0 : i32, i32, i32
  }
  func.func @transform_18(%arg0: i32, %arg1: i32) -> (i32, i32) {
    %c0_i32 = arith.constant 0 : i32
    %c0_i32_0 = arith.constant 0 : i32
    %c0_i32_1 = arith.constant 0 : i32
    return %c0_i32, %c0_i32_0 : i32, i32
  }
  func.func @transform_19(%arg0: i32, %arg1: i32) -> (i32, i32) {
    %c0_i32 = arith.constant 0 : i32
    %c0_i32_0 = arith.constant 0 : i32
    %c0_i32_1 = arith.constant 0 : i32
    return %c0_i32, %c0_i32_0 : i32, i32
  }
  func.func @transform_20(%arg0: i32, %arg1: i32) -> (i32, i32, i32) {
    %c0_i32 = arith.constant 0 : i32
    %c0_i32_0 = arith.constant 0 : i32
    %c0_i32_1 = arith.constant 0 : i32
    return %arg0, %c0_i32, %c0_i32_0 : i32, i32, i32
  }
}

</mosaic_0001>

<bundles_post_ra>
// kernel: tpu_custom_call.1
= control target key start
LH: loop header
LB: loop body
LE: loop exit
PB: predicated region body
PF: predicated region fallthrough
CT: control target
= control target key end

     0   :  { %s3917_s0 = inlined_call_operand.hbm [shape: f32[2,8,32], index: 0, kind: input, shape index: {}]   ;;  %s3918_s1 = inlined_call_operand.hbm [shape: f32[2,1,8], index: 1, kind: input, shape index: {}]   ;;  %s3919_s2 = inlined_call_operand.vmem [shape: bf16[2,32,32], index: 2, kind: input, shape index: {}]   ;;  %s3920_s3 = inlined_call_operand.hbm [shape: f32[2,1,32], index: 3, kind: input, shape index: {}]   ;;  %s3921_s4 = inlined_call_operand.vmem [shape: bf16[2,32,32], index: 4, kind: input, shape index: {}]   ;;  %s3922_s5 = inlined_call_operand.vmem [shape: f32[2,1,32], index: 5, kind: input, shape index: {}]   ;;  %s3923_s6 = inlined_call_operand.vmem [shape: bf16[2,32,32], index: 6, kind: input, shape index: {}]   ;;  %s3924_s7 = inlined_call_operand.vmem [shape: f32[2,1,32], index: 7, kind: input, shape index: {}]   ;;  %s3925_s8 = inlined_call_operand.hbm [shape: bf16[2,32,32], index: 8, kind: input, shape index: {}]   ;;  %s3926_s9 = inlined_call_operand.vmem [shape: f32[2,1,32], index: 9, kind: input, shape index: {}]   ;;  %s3927_s10 = inlined_call_operand.vmem [shape: f32[2,1,32], index: 10, kind: input, shape index: {}]   ;;  %s3928_s11 = inlined_call_operand.hbm [shape: f32[2,1,32], index: 11, kind: input, shape index: {}]   ;;  %s3929_s12 = inlined_call_operand.hbm [shape: bf16[2,32,64], index: 12, kind: input, shape index: {}]   ;;  %s3930_s13 = inlined_call_operand.vmem [shape: f32[2,1,64], index: 13, kind: input, shape index: {}]   ;;  %s3931_s14 = inlined_call_operand.vmem [shape: bf16[2,64,32], index: 14, kind: input, shape index: {}]   ;;  %s3932_s15 = inlined_call_operand.vmem [shape: f32[2,1,32], index: 15, kind: input, shape index: {}]   ;;  %s3933_s16 = inlined_call_operand.vmem [shape: f32[2,1,32], index: 16, kind: input, shape index: {}]   ;;  %s3934_s17 = inlined_call_operand.hbm [shape: f32[2,1,32], index: 17, kind: input, shape index: {}]   ;;  %s3935_s18 = inlined_call_operand.vmem [shape: f32[1,32], index: 18, kind: input, shape index: {}]   ;;  %s3936_s19 = inlined_call_operand.vmem [shape: f32[1,32], index: 19, kind: input, shape index: {}]   ;;  %s3937_s20 = inlined_call_operand.hbm [shape: f32[2,8,32], index: 20, kind: output, shape index: {}]  }
   0x1   :  { %3958 = sst [smem:[#allocation38_spill]] %s3917_s0 }
   0x2   :  { %3959 = sst [smem:[#allocation39_spill]] %s3918_s1 }
   0x3   :  { %3960 = sst [smem:[#allocation40_spill]] %s3919_s2 }
   0x4   :  { %3961 = sst [smem:[#allocation41_spill]] %s3920_s3 }
   0x5   :  { %3962 = sst [smem:[#allocation42_spill]] %s3921_s4 }
   0x6   :  { %3963 = sst [smem:[#allocation43_spill]] %s3922_s5 }
   0x7   :  { %3964 = sst [smem:[#allocation44_spill]] %s3923_s6 }
   0x8   :  { %3965 = sst [smem:[#allocation45_spill]] %s3924_s7 }
   0x9   :  { %3966 = sst [smem:[#allocation46_spill]] %s3925_s8 }
   0xa   :  { %3967 = sst [smem:[#allocation47_spill]] %s3926_s9 }
   0xb   :  { %3968 = sst [smem:[#allocation48_spill]] %s3927_s10 }
   0xc   :  { %3969 = sst [smem:[#allocation49_spill]] %s3928_s11 }
   0xd   :  { %3970 = sst [smem:[#allocation50_spill]] %s3929_s12 }
   0xe   :  { %3971 = sst [smem:[#allocation51_spill]] %s3930_s13 }
   0xf   :  { %3972 = sst [smem:[#allocation52_spill]] %s3931_s14 }
  0x10   :  { %3973 = sst [smem:[#allocation53_spill]] %s3932_s15 }
  0x11   :  { %3974 = sst [smem:[#allocation54_spill]] %s3933_s16 }
  0x12   :  { %3975 = sst [smem:[#allocation55_spill]] %s3934_s17 }
  0x13   :  { %3976 = sst [smem:[#allocation56_spill]] %s3935_s18 }
  0x14   :  { %3977 = sst [smem:[#allocation57_spill]] %s3936_s19 }
  0x15   :  { %3978 = sst [smem:[#allocation58_spill]] %s3937_s20 }
  0x16   :  { %25 = vsyncpa [#allocation4], 0 }
  0x17   :  { %27 = vsyncpa [#allocation4 + $0x1], 0 }
  0x18   :  { %28 = vsyncpa [#allocation7], 0 }
  0x19   :  { %30 = vsyncpa [#allocation7 + $0x1], 0 }
  0x1a   :  { %31 = vsyncpa [#allocation10], 0 }
  0x1b   :  { %33 = vsyncpa [#allocation10 + $0x1], 0 }
  0x1c   :  { %34 = vsyncpa [#allocation13], 0 }
  0x1d   :  { %36 = vsyncpa [#allocation13 + $0x1], 0 }
  0x1e   :  { %37 = vsyncpa [#allocation5], 0 }
  0x1f   :  { %39 = vsyncpa [#allocation5 + $0x1], 0  ;;  %s3238_s1 = smov 0   ;;  %s3240_s22 = smov 0  }
  0x20   :  { %s3242_s23 = smov 0   ;;  %s3244_s24 = smov 0  }
  0x21   :  { %s3246_s2 = smov 0   ;;  %s3248_s25 = smov 0  }
  0x22   :  { %s3250_s3 = smov 0   ;;  %s3252_s26 = smov 0  }
  0x23   :  { %s3254_s27 = smov 0   ;;  %s3256_s28 = smov 0  }
  0x24   :  { %s3258_s4 = smov 0  }
  0x25 LB: > { %3979 = sst [smem:[#allocation22_spill]] %s3084_s22  ;;  %s3294_s29 = sadd.s32 4294967295, %s3120_s4   ;;  %s3120_s4 = sphi %s3258_s4, %s45_s4   ;;  %s3116_s28 = sphi %s3256_s28, %s4058_s28   ;;  %s3112_s27 = sphi %s3254_s27, %s4057_s27   ;;  %s3108_s26 = sphi %s3252_s26, %s4056_s26   ;;  %s3104_s3 = sphi %s3250_s3, %s4055_s3   ;;  %s3100_s25 = sphi %s3248_s25, %s4054_s25   ;;  %s3096_s2 = sphi %s3246_s2, %s4053_s2   ;;  %s3092_s24 = sphi %s3244_s24, %s4052_s24   ;;  %s3088_s23 = sphi %s3242_s23, %s4051_s23   ;;  %s3084_s22 = sphi %s3240_s22, %s4050_s22   ;;  %s3080_s1 = sphi %s3238_s1, %s4049_s1  }
  0x26   : > { %3980 = sst [smem:[#allocation23_spill]] %s3088_s23  ;;  %s2468_s30 = sadd.s32 4294967294, %s3120_s4  }
  0x27   : > { %3981 = sst [smem:[#allocation24_spill]] %s3092_s24  ;;  %s54_s0 = sadd.s32 1, %s3112_s27 }
  0x28   : > { %3982 = sst [smem:[#allocation25_spill]] %s3096_s2  ;;  %s57_s21 = sadd.s32 1, %s3116_s28 }
  0x29   : > { %3983 = sst [smem:[#allocation26_spill]] %s3100_s25  ;;  %p55_p0 = scmp.ge.s32.totalorder %s54_s0, 2 }
  0x2a   : > { %3984 = sst [smem:[#allocation27_spill]] %s3104_s3  ;;  %s64_s20 = sadd.s32 1, %s3100_s25 }
  0x2b   : > { %3985 = sst [smem:[#allocation28_spill]] %s3108_s26  ;;  %p71_p1 = scmp.ne.s32.totalorder %s3100_s25, %s3096_s2 }
  0x2c   : > { %3986 = sst [smem:[#allocation29_spill]] %s3112_s27  ;;  %p72_p2 = scmp.eq.s32.totalorder %s3120_s4, 0 }
  0x2d   : > { %3987 = sst [smem:[#allocation30_spill]] %s3116_s28  ;;  %s4060_s0 = smov (%p55_p0, %s54_s0), 0 }
  0x2e   : > { %3988 = sst [smem:[#allocation31_spill]] %s3120_s4  ;;  %s4062_s21 = smov (!%p55_p0, %s57_s21), %s3116_s28 }
  0x2f   : > { %3989 = sst [smem:[#allocation32_spill]] %s4060_s0  ;;  %p3311_p3 = por %p72_p2, %p71_p1 }
  0x30   : > { %p3940_p4 = scmp.ne.s32.totalorder %s3096_s2, %s3092_s24  ;;  %p59_p5 = scmp.ge.s32.totalorder %s4062_s21, 2 }
  0x31   : > { %p78_p6 = scmp.eq.s32.totalorder %s3294_s29, 0  ;;  %s139_s19 = ssub.s32 %s3112_s27, %s4060_s0 }
  0x32   : > { %s142_s18 = sadd.s32 1, %s3088_s23  ;;  %s4064_s21 = smov (%p59_p5, %s4062_s21), 0 }
  0x33   : > { %3991 = sst [smem:[#allocation33_spill]] %s4064_s21  ;;  %p3328_p7 = por %p78_p6, %p3940_p4 }
  0x34   : > { %p140_p8 = scmp.eq.s32.totalorder %s139_s19, 0  ;;  %s61_s15 = ssub.s32 %s3116_s28, %s4064_s21 }
  0x35   : > { %p149_p9 = scmp.ne.s32.totalorder %s3088_s23, %s3084_s22  ;;  %p62_p10 = scmp.eq.s32.totalorder %s61_s15, 0 }
  0x36   : > { %p155_p11 = scmp.ne.s32.totalorder %s3084_s22, %s3080_s1  ;;  %p585_p0 = scmp.eq.s32.totalorder %s3294_s29, 3 }
  0x37   : > { %s3339_s0 = scalar_select %p140_p8, %s3088_s23, %s142_s18  }
  0x38   : > { %s3342_s14 = scalar_select %p62_p10, %s3100_s25, %s64_s20  }
  0x39   : > { %3993 = sst [smem:[#allocation34_spill]] %s3339_s0  ;;  %p3346_p12 = por %p149_p9, %p72_p2 }
  0x3a   : > { %3994 = sst [smem:[#allocation35_spill]] %s3342_s14  ;;  %p3352_p13 = por %p155_p11, %p78_p6 }
  0x3b   : > { %p591_p5 = scmp.eq.s32.totalorder %s2468_s30, 3  ;;  %p2634_p4 = scmp.lt.s32.totalorder %s3120_s4, 4 }
  0x3c   : > { %p3361_p8 = por %p585_p0, %p71_p1  ;;  %p3999_p2 = scmp.ne.s32.totalorder %s3096_s2, %s3092_s24 }
  0x3d   : > { %s3373_s19 = sand.u32 1, %s3100_s25   ;;  %p3377_p6 = pnand %p2634_p4, %p3311_p3 }
  0x3e   : > { %s3997_s15 = scalar_select %p3361_p8, 1, 0 }
  0x3f   : > { %p3368_p9 = por %p591_p5, %p3999_p2  ;;  %s3382_s1 = sand.u32 1, %s3120_s4  }
  0x40   : > { %3998 = sst [smem:[#allocation36_spill]] %s3997_s15  ;;  %s639_s24 = scalar_lea.vmem [#allocation6], %s3373_s19 }
  0x41   : > { %s4000_s18 = scalar_select %p3368_p9, 1, 0 }
  0x42   : > { %s4003_s14 = sld [smem:[#allocation39_spill]]  ;;  %p3391_p1 = pnand %p2634_p4, %p3346_p12 }
  0x43   : > { %4001 = sst [smem:[#allocation37_spill]] %s4000_s18  ;;  %s646_s18 = sshll.u32 %s639_s24, 4  ;;  %s647_s18 = int_to_ptr.vmem [resolvable:$true] %s646_s18 }
  0x44   : > { %s3947_s15 = scalar_lea.sflag [#allocation7], %s3382_s1  ;;  %p2479_p3 = scmp.ge.s32.totalorder %s3120_s4, 1 }
  0x45   : > { %p820_p10 = scmp.lt.s32.totalorder %s3120_s4, 5  ;;  %s4006_s8 = sld [smem:[#allocation46_spill]] }
  0x46   : > { %s3123_s4 = smov 4   ;;  %s4007_s12 = sld [smem:[#allocation50_spill]] }
  0x47   : > { %p3407_p11 = pnand %p2479_p3, %p820_p10  ;;  %s2471_s3 = sshll.u32 %s3373_s19, 3 }
  0x48   : > { %s642_s0 = scalar_lea.hbm %s4003_s14, %s3116_s28  ;;  %s3403_s14 = sand.u32 1, %s3088_s23  }
  0x49   : > { %s644_s25 = sshll.u32 %s642_s0, 4  ;;  %s2473_s24 = sshll.u32 %s3403_s14, 4  ;;  %s645_s25 = int_to_ptr.hbm [resolvable:$true] %s644_s25 }
  0x4a   : > { %2614 = dma.hbm_to_vmem [thread:$0]  (!%p3377_p6), %s645_s25, 16, %s647_s18, %s3947_s15  }
  0x4b   : > { %s2572_s0 = sshll.u32 %s3112_s27, 4  ;;  %s710_s7 = scalar_lea.vmem [#allocation9], %s2473_s24 }
  0x4c   : > { %s715_s9 = scalar_lea.hbm %s4006_s8, %s2572_s0  ;;  %s718_s25 = sshll.u32 %s710_s7, 4  ;;  %s719_s25 = int_to_ptr.vmem [resolvable:$true] %s718_s25 }
  0x4d   : > { %s716_s18 = sshll.u32 %s715_s9, 4  ;;  %s3952_s15 = scalar_lea.sflag [#allocation10], %s3382_s1  ;;  %s717_s18 = int_to_ptr.hbm [resolvable:$true] %s716_s18 }
  0x4e   : > { %s3122_s23 = smov 64   ;;  %s766_s21 = scalar_lea.hbm %s4007_s12, %s2572_s0 }
  0x4f   : > { %2620 = dma.hbm_to_vmem [thread:$0]  (!%p3391_p1), %s717_s18, 256, %s719_s25, %s3952_s15, %s3122_s23, %s3122_s23, %s3123_s4  }
  0x50   : > { %s761_s30 = scalar_lea.vmem [#allocation12], %s2473_s24  ;;  %s767_s7 = sshll.u32 %s766_s21, 4  ;;  %s768_s7 = int_to_ptr.hbm [resolvable:$true] %s767_s7 }
  0x51   : > { %s769_s8 = sshll.u32 %s761_s30, 4  ;;  %s758_s9 = scalar_lea.sflag [#allocation13], %s3382_s1  ;;  %s770_s8 = int_to_ptr.vmem [resolvable:$true] %s769_s8 }
  0x52   : > { %2626 = dma.hbm_to_vmem [thread:$0]  (!%p3391_p1), %s768_s7, 256, %s770_s8, %s758_s9, %s3122_s23, %s3122_s23, %s3123_s4  }
  0x53   : > { %s2472_s25 = sshll.u32 %s3116_s28, 3  ;;  %s4008_s6 = sld [smem:[#allocation38_spill]] }
  0x54   : > { %s621_s30 = scalar_lea.vmem [#allocation3], %s2471_s3  ;;  %s618_s15 = scalar_lea.sflag [#allocation4], %s3373_s19 }
  0x55   : > { %s629_s21 = sshll.u32 %s621_s30, 4  ;;  %s4009_s4 = sld [smem:[#allocation41_spill]]  ;;  %s630_s21 = int_to_ptr.vmem [resolvable:$true] %s629_s21 }
  0x56   : > { %s664_s5 = scalar_lea.vmem [#allocation8], %s3403_s14  ;;  %s4010_s3 = scalar_lea.sflag [#allocation7], %s3382_s1 }
  0x57   : > { %s4011_s11 = sld [smem:[#allocation49_spill]]  ;;  %s4012_s30 = scalar_lea.sflag [#allocation10], %s3382_s1 }
  0x58   : > { %s4013_s17 = sld [smem:[#allocation55_spill]] }
  0x59   : > { %s625_s24 = scalar_lea.hbm %s4008_s6, %s2472_s25  ;;  %s671_s25 = sshll.u32 %s664_s5, 4  ;;  %s672_s25 = int_to_ptr.vmem [resolvable:$true] %s671_s25 }
  0x5a   : > { %s627_s0 = sshll.u32 %s625_s24, 4  ;;  %s743_s24 = scalar_lea.vmem [#allocation11], %s3403_s14  ;;  %s628_s0 = int_to_ptr.hbm [resolvable:$true] %s627_s0 }
  0x5b   : > { %2611 = dma.hbm_to_vmem [thread:$0]  (!%p3377_p6), %s628_s0, 128, %s630_s21, %s618_s15  }
  0x5c   : > { %s667_s7 = scalar_lea.hbm %s4009_s4, %s3112_s27  ;;  %s750_s0 = sshll.u32 %s743_s24, 4  ;;  %s751_s0 = int_to_ptr.vmem [resolvable:$true] %s750_s0 }
  0x5d   : > { %s669_s18 = sshll.u32 %s667_s7, 4  ;;  %s746_s20 = scalar_lea.hbm %s4011_s11, %s3112_s27  ;;  %s670_s18 = int_to_ptr.hbm [resolvable:$true] %s669_s18 }
  0x5e   : > { %2617 = dma.hbm_to_vmem [thread:$0]  (!%p3391_p1), %s670_s18, 16, %s672_s25, %s4010_s3  }
  0x5f   : > { %s748_s15 = sshll.u32 %s746_s20, 4  ;;  %s811_s23 = scalar_lea.hbm %s4013_s17, %s3112_s27  ;;  %s749_s15 = int_to_ptr.hbm [resolvable:$true] %s748_s15 }
  0x60   : > { %2623 = dma.hbm_to_vmem [thread:$0]  (!%p3391_p1), %s749_s15, 16, %s751_s0, %s4012_s30  }
  0x61   : > { %s813_s4 = sshll.u32 %s811_s23, 4  ;;  %s808_s7 = scalar_lea.vmem [#allocation14], %s3403_s14  ;;  %s814_s4 = int_to_ptr.hbm [resolvable:$true] %s813_s4 }
  0x62   : > { %s815_s5 = sshll.u32 %s808_s7, 4  ;;  %824 = sbr.rel (%p3407_p11) target bundleno = 2333 (0x91d), region = 100  ;;  %s816_s5 = int_to_ptr.vmem [resolvable:$true] %s815_s5 }
  0x63   : > { %2629 = dma.hbm_to_vmem [thread:$0]  (!%p3391_p1), %s814_s4, 16, %s816_s5, %s758_s9  }
  0x64   : > { %s3465_s18 = sand.u32 (!%p3407_p11), 1, %s3096_s2  }
  0x65   : > { %s3953_s25 = sshll.u32 (!%p3407_p11), %s3465_s18, 3  ;;  %s827_s3 = scalar_lea.sflag (!%p3407_p11), [#allocation4], %s3465_s18 }
  0x66   : > { %s3471_s14 = scalar_lea.vmem (!%p3407_p11), [#allocation3], %s3953_s25 }
  0x67   : > { %3055 = dma.done.wait (%p3328_p7), %s827_s3, 128  }
  0x68   : > { %3057 = vsyncadd (%p3328_p7), %s827_s3, 4294967168  ;;  %s836_s1 = sand.u32 1, %s3294_s29  }
  0x69   : > { %s837_s26 = scalar_lea.sflag [#allocation7], %s836_s1 }
  0x6a   : > { %3059 = dma.done.wait (%p3328_p7), %s837_s26, 16  }
  0x6b   : > { %3061 = vsyncadd (%p3328_p7), %s837_s26, 4294967280  ;;  %s3484_s9 = sand.u32 1, %s3084_s22  }
  0x6c   : > { %3063 = dma.done.wait (%p3352_p13), %s837_s26, 16  }
  0x6d   : > { %3065 = vsyncadd (%p3352_p13), %s837_s26, 4294967280  ;;  %s2481_s29 = sshll.u32 %s3484_s9, 4  ;;  %s855_s19 = scalar_lea.sflag [#allocation10], %s836_s1 }
  0x6e   : > { %s3492_s20 = scalar_lea.vmem [#allocation9], %s2481_s29 }
  0x6f   : > { %3067 = dma.done.wait (%p3352_p13), %s855_s19, 272  }
  0x70   : > { %3069 = vsyncadd (%p3352_p13), %s855_s19, 4294967024  ;;  %s874_s15 = scalar_lea.sflag [#allocation13], %s836_s1  ;;  %s3499_s24 = scalar_lea.vmem [#allocation12], %s2481_s29 }
  0x71   : > { %3071 = dma.done.wait (%p3352_p13), %s874_s15, 272  }
  0x72   : > { %3073 = vsyncadd (%p3352_p13), %s874_s15, 4294967024  ;;  %s4014_s0 = sld [smem:[#allocation27_spill]]  ;;  %s886_s4 = scalar_lea.vmem [#allocation14], %s3484_s9 }
  0x73   : > { %s4016_s3 = sld [smem:[#allocation40_spill]]  ;;  %s4026_s7 = sshll.u32 %s3465_s18, 3 }
  0x74   : > { %s4017_s19 = sld [smem:[#allocation42_spill]] }
  0x75   : > { %s4018_s6 = sld [smem:[#allocation44_spill]] }
  0x76   : > { %s4021_s5 = sld [smem:[#allocation48_spill]] }
  0x77   : > { %s4022_s29 = sld [smem:[#allocation51_spill]] }
  0x78   : > { %p1011_p4 = scmp.lt.s32.totalorder %s4014_s0, 1  ;;  %s4023_s16 = sld [smem:[#allocation52_spill]] }
  0x79   : > { %s4024_s17 = sld [smem:[#allocation53_spill]]  ;;  %p2492_p7 = scmp.ne.s32.totalorder %s4014_s0, 0 }
  0x7a   : > { %s3507_s30 = scalar_select %p1011_p4, %s4014_s0, 1 }
  0x7b   : > { %s4025_s10 = sld [smem:[#allocation54_spill]] }
  0x7c   : > { %s2574_s21 = sshll.u32 %s3507_s30, 4  ;;  %s2577_s22 = sshll.u32 %s3507_s30, 5 }
  0x7d   : > { %s1015_s1 = scalar_lea.vmem %s4016_s3, %s2574_s21  ;;  %s1020_s15 = scalar_lea.vmem %s4017_s19, %s2574_s21 }
  0x7e   : > { %s3523_s25 = scalar_lea.vmem %s4018_s6, %s2574_s21  ;;  %s1037_s3 = scalar_lea.vmem %s4021_s5, %s3507_s30 }
  0x7f   : > { %s1040_s19 = scalar_lea.vmem %s4022_s29, %s3507_s30  ;;  %s3545_s21 = scalar_lea.vmem %s4023_s16, %s2577_s22 }
  0x80   : > { %s1048_s28 = scalar_lea.vmem %s4024_s17, %s3507_s30  ;;  %s3558_s5 = scalar_lea.vmem [#allocation15], %s4026_s7 }
  0x81   : > { %s1051_s23 = scalar_lea.vmem %s4025_s10, %s3507_s30  ;;  %1056 = sbr.rel (%p2492_p7) target bundleno = 136 (0x88), region = 132 }
  0x86   : > { %v1057_v0 = vld [vmem:[%s3471_s14] sm:$0xff]  ;;  %vm1058_vm0 = vcmask 261120  }
  0x87   : > { %1059 = vst.msk [vmem:[#allocation2] sm:$0xff] %vm1058_vm0, %v1057_v0 }
  0x88 PF: > { %v2579_v1 = vld [vmem:[%s1015_s1 + $0x8] sm:$0xff]  ;;  %v2578_v3 = vld [vmem:[%s1015_s1] sm:$0xff]  ;;  %vm1083_vm1 = vcmask 261120   ;;  %s4027_s22 = scalar_lea.vmem [#allocation8], %s3484_s9  ;;  %s4028_s0 = sld [smem:[#allocation43_spill]]  ;;  %vm1177_vm2 = vcmask 1047556  }
  0x89   : > { %v2581_v2 = vld [vmem:[%s1020_s15 + $0x8] sm:$0xff]  ;;  %v2580_v4 = vld [vmem:[%s1020_s15] sm:$0xff]  ;;  %1093 = vmatpush.bf16.msra.mxu0 %v2579_v1  ;;  %s3124_s15 = smov 112   ;;  %s3125_s26 = smov 104   ;;  %v3127_v17 = vmov 1983009808  }
  0x8a   : > { %1126 = vmatpush.bf16.msra.mxu1 %v2581_v2  ;;  %v2735_v7 = vld [vmem:[%s4027_s22] ss:$0 sm:$0xff]  ;;  %s3126_s29 = smov 120   ;;  %v1182_v18 = vunpack.c.l.s4 %v3127_v17  ;;  %v3128_v24 = vmov 1934713408   ;;  %vm1527_vm3 = vcmask 64512  }
  0x8b   : > { %v1206_v25 = vunpack.c.l.s4 %v3128_v24  ;;  %s4031_s16 = sld [smem:[#allocation45_spill]]  ;;  %s3129_s12 = smov 16   ;;  %vm1902_vm4 = vcmask 130048   ;;  %vm1904_vm5 = vcmask 195584   ;;  %vm2058_vm10 = vcmask 523264  }
  0x8c   : > { %v3585_v21 = vunpack.c.0.s8 %v1182_v18  ;;  %s3130_s17 = smov 24   ;;  %s3131_s27 = smov 8  }
  0x8d   : > { %1094 = vmatpush.bf16.msra.mxu0 %v2578_v3  ;;  %v3591_v32 = vunpack.c.0.s8 %v1206_v25  ;;  %s4033_s7 = sld [smem:[#allocation47_spill]]  ;;  %s4036_s14 = scalar_lea.vmem [#allocation11], %s3484_s9 }
  0x8e   : > { %v3562_v5 = vld [vmem:[#allocation2] sm:$0xff]  ;;  %1127 = vmatpush.bf16.msra.mxu1 %v2580_v4  ;;  %s4029_s1 = scalar_lea.vmem %s4028_s0, %s3507_s30 }
  0x8f   : > { %v3566_v6 = vpack.c.bf16 %v3562_v5, %v3562_v5  ;;  %v2736_v8 = vld [vmem:[%s4029_s1] ss:$0 sm:$0xff] }
  0x91   : > { %2501 = vmatmul.msk.bf16.vlgmr.msra.gmra.mxu0 %vm1083_vm1, %v3566_v6  ;;  %2510 = vmatmul.msk.bf16.vlgmr.msra.gmra.mxu1 %vm1083_vm1, %v3566_v6  ;;  %s4032_s11 = scalar_lea.vmem %s4031_s16, %s3507_s30 }
  0x93   : > { %s4034_s22 = scalar_lea.vmem %s4033_s7, %s3507_s30 }
 0x10e   : > { %v1096_v9 = vpop.f32.mrf.mxu0  ;;  %v1129_v10 = vpop.f32.mrf.mxu1 }
 0x10f   : > { %v1097_v11 = vadd.f32 %v2735_v7, %v1096_v9  ;;  %v1130_v12 = vadd.f32 %v2736_v8, %v1129_v10 }
 0x111   : > { %1291 = vrot.lane.b32.xlu0 %v1130_v12, %s3124_s15  ;;  %1173 = vrot.lane.b32.xlu2 %v1097_v11, %s3125_s26  ;;  %v1179_v29 = vrot.slane %v1097_v11, 4  ;;  %v1299_v36 = vrot.slane %v1130_v12, 4 }
 0x112   : > { %1170 = vrot.lane.b32.xlu1 %v1097_v11, %s3124_s15 }
 0x116   : > { %v1098_v13 = vpop.f32.mrf.mxu0  ;;  %v1131_v14 = vpop.f32.mrf.mxu1 }
 0x119   : > { %1294 = vrot.lane.b32.xlu0 %v1130_v12, %s3125_s26  ;;  %1167 = vrot.lane.b32.xlu2 %v1097_v11, %s3126_s29 }
 0x11a   : > { %1288 = vrot.lane.b32.xlu1 %v1130_v12, %s3126_s29 }
 0x16b   : > { %v1174_v15 = vpop.permute.xlu2 %1173 }
 0x16c   : > { %v1189_v20 = vrot.slane %v1174_v15, 4 }
 0x173   : > { %v1168_v16 = vpop.permute.xlu2 %1167 }
 0x174   : > { %v1191_v19 = vrot.slane %v1168_v16, 4  ;;  %v1190_v23 = vsel %vm1177_vm2, %v1189_v20, %v1168_v16 }
 0x175   : > { %v1196_v27 = vperm.slane %v1190_v23, %v3585_v21 }
 0x176   : > { %v1192_v22 = vsel %vm1177_vm2, %v1174_v15, %v1191_v19 }
 0x177   : > { %v1200_v26 = vperm.slane %v1192_v22, %v3585_v21  ;;  %v1201_v38 = vrot.slane %v1196_v27, 4  ;;  %v2582_v22 = vld [vmem:[%s3523_s25] sm:$0xff] }
 0x179   : > { %v1213_v35 = vrot.slane %v1200_v26, 4 }
 0x183   : > { %v1292_v28 = vpop.permute.xlu0 %1291 }
 0x184   : > { %v1171_v30 = vpop.permute.xlu1 %1170  ;;  %v1297_v31 = vrot.slane %v1292_v28, 4  ;;  %v1300_v40 = vsel %vm1177_vm2, %v1292_v28, %v1299_v36 }
 0x185   : > { %v1176_v33 = vrot.slane %v1171_v30, 4  ;;  %v1180_v34 = vsel %vm1177_vm2, %v1171_v30, %v1179_v29  ;;  %v1308_v49 = vperm.slane %v1300_v40, %v3585_v21 }
 0x186   : > { %v1188_v37 = vperm.slane %v1180_v34, %v3585_v21  ;;  %v1298_v44 = vsel %vm1177_vm2, %v1297_v31, %v1130_v12  ;;  %v2583_v12 = vld [vmem:[%s3523_s25 + $0x8] sm:$0xff]  ;;  %s4030_s25 = scalar_lea.vmem [#allocation6], %s3465_s18 }
 0x187   : > { %v1178_v39 = vsel %vm1177_vm2, %v1176_v33, %v1097_v11  ;;  %v1304_v53 = vperm.slane %v1298_v44, %v3585_v21  ;;  %v1335_v63 = vrot.slane %v1308_v49, 4  ;;  %1159 = vmatpush.bf16.msra.mxu2 %v2583_v12 }
 0x188   : > { %v1184_v41 = vperm.slane %v1178_v39, %v3585_v21  ;;  %v1214_v42 = vsel %vm1177_vm2, %v1213_v35, %v1188_v37  ;;  %v1215_v43 = vrot.slane %v1188_v37, 4 }
 0x189   : > { %v1220_v45 = vperm.slane %v1214_v42, %v3591_v32  ;;  %v1323_v2 = vrot.slane %v1304_v53, 4 }
 0x18a   : > { %v1202_v46 = vsel %vm1177_vm2, %v1201_v38, %v1184_v41  ;;  %v1203_v47 = vrot.slane %v1184_v41, 4  ;;  %v1216_v48 = vsel %vm1177_vm2, %v1200_v26, %v1215_v43 }
 0x18b   : > { %v1208_v50 = vperm.slane %v1202_v46, %v3591_v32  ;;  %v1224_v51 = vperm.slane %v1216_v48, %v3591_v32  ;;  %v1295_v52 = vpop.permute.xlu0 %1294  ;;  %v1229_v59 = vrot.slane %v1220_v45, 4  ;;  %1160 = vmatpush.bf16.msra.mxu2 %v2582_v22 }
 0x18c   : > { %v1204_v54 = vsel %vm1177_vm2, %v1196_v27, %v1203_v47  ;;  %v1309_v55 = vrot.slane %v1295_v52, 4  ;;  %v1289_v56 = vpop.permute.xlu1 %1288 }
 0x18d   : > { %v1212_v57 = vperm.slane %v1204_v54, %v3591_v32  ;;  %v1225_v58 = vrot.slane %v1208_v50, 4  ;;  %v1231_v60 = vrot.slane %v1224_v51, 4  ;;  %v1311_v62 = vrot.slane %v1289_v56, 4 }
 0x18e   : > { %v1310_v61 = vsel %vm1177_vm2, %v1309_v55, %v1289_v56  ;;  %v1230_v10 = vsel %vm1177_vm2, 0.0, %v1229_v59  ;;  %2519 = vmatmul.msk.bf16.vlgmr.msra.gmra.mxu2 %vm1083_vm1, %v3566_v6 }
 0x18f   : > { %v1227_v0 = vrot.slane %v1212_v57, 4  ;;  %v1232_v1 = vsel %vm1177_vm2, 0.0, %v1231_v60  ;;  %v1312_v4 = vsel %vm1177_vm2, %v1295_v52, %v1311_v62  ;;  %v1316_v7 = vperm.slane %v1310_v61, %v3585_v21 }
 0x190   : > { %v1249_v3 = vrot.slane %v1232_v1, 4  ;;  %v1226_v8 = vsel %vm1177_vm2, 0.0, %v1225_v58  ;;  %v1320_v11 = vperm.slane %v1312_v4, %v3585_v21  ;;  %v1244_v31 = vsel %vm1177_vm2, %v1231_v60, %v1220_v45 }
 0x191   : > { %v1228_v9 = vsel %vm1177_vm2, 0.0, %v1227_v0  ;;  %v1321_v15 = vrot.slane %v1316_v7, 4  ;;  %v1324_v16 = vsel %vm1177_vm2, %v1316_v7, %v1323_v2  ;;  %v1233_v20 = vsel %vm1177_vm2, %v1227_v0, %v1208_v50 }
 0x192   : > { %v1238_v13 = vrot.slane %v1228_v9, 4  ;;  %v1250_v14 = vsel %vm1177_vm2, %v1249_v3, %v1230_v10  ;;  %v1332_v17 = vperm.slane %v1324_v16, %v3591_v32  ;;  %v1333_v18 = vrot.slane %v1320_v11, 4 }
 0x193   : > { %v1336_v19 = vsel %vm1177_vm2, %v1320_v11, %v1335_v63  ;;  %v1254_v23 = vperm.slane %v1250_v14, %v3585_v21  ;;  %v1322_v24 = vsel %vm1177_vm2, %v1321_v15, %v1304_v53  ;;  %v1237_v35 = vperm.slane %v1233_v20, %v3585_v21 }
 0x194   : > { %v1344_v25 = vperm.slane %v1336_v19, %v3591_v32  ;;  %v1239_v26 = vsel %vm1177_vm2, %v1238_v13, %v1226_v8  ;;  %v1328_v27 = vperm.slane %v1322_v24, %v3591_v32  ;;  %v1334_v28 = vsel %vm1177_vm2, %v1333_v18, %v1308_v49 }
 0x195   : > { %v1347_v29 = vrot.slane %v1332_v17, 4  ;;  %v1243_v30 = vperm.slane %v1239_v26, %v3585_v21  ;;  %v1340_v33 = vperm.slane %v1334_v28, %v3591_v32  ;;  %v1267_v47 = vrot.slane %v1254_v23, 4 }
 0x196   : > { %v1351_v34 = vrot.slane %v1344_v25, 4  ;;  %v1345_v36 = vrot.slane %v1328_v27, 4  ;;  %v1248_v52 = vperm.slane %v1244_v31, %v3585_v21  ;;  %v1257_v10 = vrot.slane %v1237_v35, 4 }
 0x197   : > { %v1348_v37 = vsel %vm1177_vm2, 0.0, %v1347_v29  ;;  %v1353_v38 = vsel %vm1177_vm2, %v1347_v29, %v1328_v27  ;;  %v1255_v39 = vrot.slane %v1243_v30, 4  ;;  %v1349_v40 = vrot.slane %v1340_v33, 4 }
 0x198   : > { %v1352_v41 = vsel %vm1177_vm2, 0.0, %v1351_v34  ;;  %v1358_v42 = vrot.slane %v1348_v37, 4  ;;  %v1357_v43 = vperm.slane %v1353_v38, %v3585_v21  ;;  %v1346_v44 = vsel %vm1177_vm2, 0.0, %v1345_v36 }
 0x199   : > { %v1369_v45 = vrot.slane %v1352_v41, 4  ;;  %v1364_v46 = vsel %vm1177_vm2, %v1351_v34, %v1340_v33  ;;  %v1350_v48 = vsel %vm1177_vm2, 0.0, %v1349_v40  ;;  %v1256_v57 = vsel %vm1177_vm2, %v1255_v39, %v1237_v35  ;;  %v2737_v33 = vld [vmem:[%s4030_s25] ss:$0 sm:$0xff]  ;;  %s4040_s25 = sld [smem:[#allocation27_spill]] }
 0x19a   : > { %v1359_v49 = vsel %vm1177_vm2, %v1358_v42, %v1346_v44  ;;  %v1368_v50 = vperm.slane %v1364_v46, %v3585_v21  ;;  %v1377_v51 = vrot.slane %v1357_v43, 4  ;;  %v1268_v60 = vsel %vm1177_vm2, %v1267_v47, %v1248_v52 }
 0x19b   : > { %v1363_v53 = vperm.slane %v1359_v49, %v3585_v21  ;;  %v1370_v54 = vsel %vm1177_vm2, %v1369_v45, %v1350_v48  ;;  %v1262_v1 = vperm.slane %v1256_v57, %v3591_v32  ;;  %v1274_v4 = vperm.slane %v1268_v60, %v3591_v32 }
 0x19c   : > { %v1374_v55 = vperm.slane %v1370_v54, %v3585_v21  ;;  %v1389_v56 = vrot.slane %v1368_v50, 4  ;;  %v1269_v7 = vrot.slane %v1248_v52, 4  ;;  %v1258_v20 = vsel %vm1177_vm2, %v1243_v30, %v1257_v10 }
 0x19d   : > { %v1375_v58 = vrot.slane %v1363_v53, 4  ;;  %v1378_v59 = vsel %vm1177_vm2, %v1363_v53, %v1377_v51  ;;  %v1281_v14 = vrot.slane %v1262_v1, 4  ;;  %v1279_v16 = vrot.slane %v1274_v4, 4  ;;  %v2738_v51 = vld [vmem:[%s4032_s11] ss:$0 sm:$0xff] }
 0x19e   : > { %v1387_v61 = vrot.slane %v1374_v55, 4  ;;  %v1386_v62 = vperm.slane %v1378_v59, %v3591_v32  ;;  %v1390_v6 = vsel %vm1177_vm2, %v1374_v55, %v1389_v56  ;;  %v1270_v17 = vsel %vm1177_vm2, %v1254_v23, %v1269_v7 }
 0x19f   : > { %v1376_v63 = vsel %vm1177_vm2, %v1375_v58, %v1357_v43  ;;  %v1398_v0 = vperm.slane %v1390_v6, %v3591_v32  ;;  %v1282_v24 = vsel %vm1177_vm2, %v1274_v4, %v1281_v14  ;;  %v1278_v23 = vperm.slane %v1270_v17, %v3591_v32  ;;  %p2567_p12 = scmp.ne.s32.totalorder %s4040_s25, 1 }
 0x1a0   : > { %v1382_v2 = vperm.slane %v1376_v63, %v3591_v32  ;;  %v1388_v3 = vsel %vm1177_vm2, %v1387_v61, %v1368_v50  ;;  %v1405_v12 = vrot.slane %v1386_v62, 4  ;;  %v1280_v25 = vsel %vm1177_vm2, %v1279_v16, %v1262_v1  ;;  %s4042_s6 = sld [smem:[#allocation57_spill]] (!%p2567_p12) }
 0x1a1   : > { %v1394_v8 = vperm.slane %v1388_v3, %v3591_v32  ;;  %v1403_v9 = vrot.slane %v1398_v0, 4  ;;  %v1266_v26 = vperm.slane %v1258_v20, %v3591_v32  ;;  %v1283_v27 = vrot.slane %v1278_v23, 4 }
 0x1a2   : > { %v1401_v11 = vrot.slane %v1382_v2, 4  ;;  %v1406_v22 = vsel %vm1177_vm2, %v1398_v0, %v1405_v12 }
 0x1a3   : > { %v1399_v13 = vrot.slane %v1394_v8, 4  ;;  %v1404_v19 = vsel %vm1177_vm2, %v1403_v9, %v1386_v62  ;;  %v1285_v28 = vrot.slane %v1266_v26, 4  ;;  %v1284_v29 = vsel %vm1177_vm2, %v1283_v27, %v1266_v26 }
 0x1a4   : > { %v1402_v15 = vsel %vm1177_vm2, %v1394_v8, %v1401_v11 }
 0x1a5   : > { %v1400_v18 = vsel %vm1177_vm2, %v1399_v13, %v1382_v2  ;;  %2522 = vmatpush.xpose.msk.msra.mxu3 %vm1527_vm3, %v1402_v15  ;;  %v1286_v30 = vsel %vm1177_vm2, %v1278_v23, %v1285_v28 }
 0x1a6   : > { %2520 = vmatpush.xpose.msk.msrb.mxu0 %vm1527_vm3, %v1400_v18 }
 0x1a8   : > { %2523 = vmatmul.msk.f32.vlgmr.msra.gmra.mxu3 %vm1527_vm3, %v1282_v24 }
 0x1a9   : > { %2524 = vmatpush.xpose.msk.msrb.mxu3 %vm1527_vm3, %v1404_v19  ;;  %2521 = vmatmul.msk.f32.vlgmr.msrb.gmra.mxu0 %vm1527_vm3, %v1280_v25 }
 0x1aa   : > { %2526 = vmatpush.xpose.msk.msra.mxu0 %vm1527_vm3, %v1406_v22 }
 0x1b0   : > { %2525 = vmatmul.msk.f32.vlgmr.msrb.gmra.mxu3 %vm1527_vm3, %v1284_v29 }
 0x1b1   : > { %2527 = vmatmul.msk.f32.vlgmr.msra.gmra.mxu0 %vm1527_vm3, %v1286_v30 }
 0x211   : > { %v1162_v31 = vpop.f32.mrf.mxu2 }
 0x212   : > { %v1163_v52 = vadd.f32 %v2738_v51, %v1162_v31 }
 0x214   : > { %v1419_v9 = vrot.slane %v1163_v52, 4 }
 0x219   : > { %v1164_v34 = vpop.f32.mrf.mxu2 }
 0x226   : > { %v1551_v35 = vpop.f32.mrf.mxu0 }
 0x227   : > { %v1632_v36 = vmul.f32 0.35355338, %v1551_v35 }
 0x229   : > { %v1639_v37 = vadd.f32 %v2737_v33, %v1632_v36 }
 0x22b   : > { %v1577_v38 = vpop.f32.mrf.mxu3  ;;  %v1643_v39 = vsel %vm1527_vm3, %v1639_v37, -inf }
 0x22c   : > { %v1633_v40 = vmul.f32 0.35355338, %v1577_v38  ;;  %1644 = vmax.xlane.f32.xlu2 %v1643_v39 }
 0x22e   : > { %v1629_v41 = vpop.f32.mrf.mxu0  ;;  %v1640_v42 = vadd.f32 %v2737_v33, %v1633_v40 }
 0x22f   : > { %v1635_v43 = vmul.f32 0.35355338, %v1629_v41 }
 0x230   : > { %v1646_v44 = vsel %vm1527_vm3, %v1640_v42, -inf }
 0x231   : > { %1647 = vmax.xlane.f32.xlu1 %v1646_v44  ;;  %v1642_v45 = vadd.f32 %v2737_v33, %v1635_v43 }
 0x233   : > { %v1603_v46 = vpop.f32.mrf.mxu3  ;;  %v1652_v47 = vsel %vm1527_vm3, %v1642_v45, -inf }
 0x234   : > { %v1634_v48 = vmul.f32 0.35355338, %v1603_v46  ;;  %1653 = vmax.xlane.f32.xlu2 %v1652_v47 }
 0x236   : > { %v1641_v49 = vadd.f32 %v2737_v33, %v1634_v48 }
 0x238   : > { %v1649_v50 = vsel %vm1527_vm3, %v1641_v49, -inf }
 0x239   : > { %1650 = vmax.xlane.f32.xlu0 %v1649_v50 }
 0x24a   : > { %1411 = vrot.lane.b32.xlu1 %v1163_v52, %s3124_s15 }
 0x24c   : > { %1414 = vrot.lane.b32.xlu2 %v1163_v52, %s3125_s26 }
 0x24d   : > { %1408 = vrot.lane.b32.xlu0 %v1163_v52, %s3126_s29 }
 0x29f   : > { %v1645_v53 = vpop.xlane.xlu2 %1644 }
 0x2a0   : > { %v1655_v54 = vsub.f32 %v1639_v37, %v1645_v53 }
 0x2a2   : > { %v1659_v55 = vmul.f32 1.442695, %v1655_v54 }
 0x2a4   : > { %2746 = vpow2.f32 %v1659_v55  ;;  %v1648_v56 = vpop.xlane.xlu1 %1647 }
 0x2a5   : > { %v1656_v57 = vsub.f32 %v1640_v42, %v1648_v56 }
 0x2a7   : > { %v1661_v58 = vmul.f32 1.442695, %v1656_v57  ;;  %v1654_v61 = vpop.xlane.xlu2 %1653 }
 0x2a8   : > { %v1658_v0 = vsub.f32 %v1642_v45, %v1654_v61 }
 0x2a9   : > { %2748 = vpow2.f32 %v1661_v58 }
 0x2aa   : > { %v3695_v59 = vpop.eup %2746  ;;  %v1665_v3 = vmul.f32 1.442695, %v1658_v0 }
 0x2ab   : > { %v1667_v60 = vsel %vm1527_vm3, %v3695_v59, 0.0 }
 0x2ac   : > { %1668 = vadd.xlane.f32.xlu2 %v1667_v60  ;;  %v1651_v62 = vpop.xlane.xlu0 %1650 }
 0x2ad   : > { %v1657_v6 = vsub.f32 %v1641_v49, %v1651_v62 }
 0x2af   : > { %v3699_v63 = vpop.eup %2748  ;;  %v1663_v1 = vmul.f32 1.442695, %v1657_v6  ;;  %v1415_v8 = vpop.permute.xlu2 %1414 }
 0x2b0   : > { %v1670_v2 = vsel %vm1527_vm3, %v3699_v63, 0.0  ;;  %v1429_v11 = vrot.slane %v1415_v8, 4 }
 0x2b1   : > { %2750 = vpow2.f32 %v1663_v1  ;;  %1671 = vadd.xlane.f32.xlu1 %v1670_v2 }
 0x2b2   : > { %2752 = vpow2.f32 %v1665_v3 }
 0x2b7   : > { %v3703_v4 = vpop.eup %2750 }
 0x2b8   : > { %v1673_v7 = vsel %vm1527_vm3, %v3703_v4, 0.0  ;;  %v3707_v12 = vpop.eup %2752 }
 0x2b9   : > { %1674 = vadd.xlane.f32.xlu0 %v1673_v7  ;;  %v1676_v22 = vsel %vm1527_vm3, %v3707_v12, 0.0 }
 0x2bc   : > { %v1412_v10 = vpop.permute.xlu1 %1411 }
 0x2bd   : > { %v1417_v13 = vrot.slane %v1412_v10, 4  ;;  %v1420_v14 = vsel %vm1177_vm2, %v1412_v10, %v1419_v9 }
 0x2be   : > { %v1428_v16 = vperm.slane %v1420_v14, %v3585_v21 }
 0x2bf   : > { %v1418_v15 = vsel %vm1177_vm2, %v1417_v13, %v1163_v52  ;;  %v1409_v17 = vpop.permute.xlu0 %1408 }
 0x2c0   : > { %v1424_v18 = vperm.slane %v1418_v15, %v3585_v21  ;;  %v1430_v19 = vsel %vm1177_vm2, %v1429_v11, %v1409_v17  ;;  %v1431_v20 = vrot.slane %v1409_v17, 4  ;;  %v1455_v26 = vrot.slane %v1428_v16, 4 }
 0x2c1   : > { %v1436_v24 = vperm.slane %v1430_v19, %v3585_v21  ;;  %1677 = vadd.xlane.f32.xlu0 %v1676_v22 }
 0x2c2   : > { %v1443_v23 = vrot.slane %v1424_v18, 4  ;;  %v1432_v25 = vsel %vm1177_vm2, %v1415_v8, %v1431_v20 }
 0x2c3   : > { %v1440_v27 = vperm.slane %v1432_v25, %v3585_v21  ;;  %v1441_v28 = vrot.slane %v1436_v24, 4 }
 0x2c4   : > { %v1444_v29 = vsel %vm1177_vm2, %v1436_v24, %v1443_v23 }
 0x2c5   : > { %v1442_v30 = vsel %vm1177_vm2, %v1441_v28, %v1424_v18  ;;  %v1452_v31 = vperm.slane %v1444_v29, %v3591_v32  ;;  %v1453_v33 = vrot.slane %v1440_v27, 4  ;;  %v1456_v34 = vsel %vm1177_vm2, %v1440_v27, %v1455_v26 }
 0x2c6   : > { %v1448_v35 = vperm.slane %v1442_v30, %v3591_v32  ;;  %v1464_v36 = vperm.slane %v1456_v34, %v3591_v32 }
 0x2c7   : > { %v1454_v37 = vsel %vm1177_vm2, %v1453_v33, %v1428_v16  ;;  %v1467_v38 = vrot.slane %v1452_v31, 4 }
 0x2c8   : > { %v1460_v39 = vperm.slane %v1454_v37, %v3591_v32  ;;  %v1465_v40 = vrot.slane %v1448_v35, 4  ;;  %v1471_v41 = vrot.slane %v1464_v36, 4 }
 0x2c9   : > { %v1468_v42 = vsel %vm1177_vm2, 0.0, %v1467_v38  ;;  %v1473_v43 = vsel %vm1177_vm2, %v1467_v38, %v1448_v35 }
 0x2ca   : > { %v1466_v44 = vsel %vm1177_vm2, 0.0, %v1465_v40  ;;  %v1469_v45 = vrot.slane %v1460_v39, 4  ;;  %v1472_v46 = vsel %vm1177_vm2, 0.0, %v1471_v41  ;;  %v1477_v47 = vperm.slane %v1473_v43, %v3585_v21 }
 0x2cb   : > { %v1478_v48 = vrot.slane %v1468_v42, 4  ;;  %v1489_v49 = vrot.slane %v1472_v46, 4  ;;  %v1484_v50 = vsel %vm1177_vm2, %v1471_v41, %v1460_v39 }
 0x2cc   : > { %v1470_v51 = vsel %vm1177_vm2, 0.0, %v1469_v45  ;;  %v1488_v52 = vperm.slane %v1484_v50, %v3585_v21  ;;  %v1497_v53 = vrot.slane %v1477_v47, 4 }
 0x2cd   : > { %v1479_v54 = vsel %vm1177_vm2, %v1478_v48, %v1466_v44  ;;  %v1490_v55 = vsel %vm1177_vm2, %v1489_v49, %v1470_v51 }
 0x2ce   : > { %v1483_v56 = vperm.slane %v1479_v54, %v3585_v21  ;;  %v1494_v57 = vperm.slane %v1490_v55, %v3585_v21  ;;  %v1509_v58 = vrot.slane %v1488_v52, 4 }
 0x2d0   : > { %v1498_v60 = vsel %vm1177_vm2, %v1483_v56, %v1497_v53  ;;  %v1510_v61 = vsel %vm1177_vm2, %v1494_v57, %v1509_v58  ;;  %v1495_v62 = vrot.slane %v1483_v56, 4  ;;  %v1507_v6 = vrot.slane %v1494_v57, 4 }
 0x2d1   : > { %v1506_v0 = vperm.slane %v1498_v60, %v3591_v32  ;;  %v1518_v1 = vperm.slane %v1510_v61, %v3591_v32 }
 0x2d2   : > { %v1496_v2 = vsel %vm1177_vm2, %v1495_v62, %v1477_v47  ;;  %v1508_v3 = vsel %vm1177_vm2, %v1507_v6, %v1488_v52 }
 0x2d3   : > { %v1525_v7 = vrot.slane %v1506_v0, 4  ;;  %v1523_v8 = vrot.slane %v1518_v1, 4  ;;  %v1502_v9 = vperm.slane %v1496_v2, %v3591_v32  ;;  %v1514_v10 = vperm.slane %v1508_v3, %v3591_v32 }
 0x2d5   : > { %v1526_v11 = vsel %vm1177_vm2, %v1518_v1, %v1525_v7  ;;  %v1524_v13 = vsel %vm1177_vm2, %v1523_v8, %v1506_v0  ;;  %v1521_v14 = vrot.slane %v1502_v9, 4  ;;  %v1519_v15 = vrot.slane %v1514_v10, 4 }
 0x2d6   : > { %1774 = vmatpush.msrb.mxu0 %v1526_v11  ;;  %1751 = vmatpush.msra.mxu3 %v1524_v13 }
 0x2d7   : > { %v1522_v16 = vsel %vm1177_vm2, %v1514_v10, %v1521_v14  ;;  %v1520_v17 = vsel %vm1177_vm2, %v1519_v15, %v1502_v9 }
 0x2d8   : > { %1728 = vmatpush.msrb.mxu2 %v1522_v16  ;;  %1705 = vmatpush.msrb.mxu1 %v1520_v17 }
 0x31f   : > { %v1669_v18 = vpop.xlane.xlu2 %1668 }
 0x320   : > { %2754 = vrcp.f32 %v1669_v18 }
 0x324   : > { %v1672_v19 = vpop.xlane.xlu1 %1671 }
 0x325   : > { %2756 = vrcp.f32 %v1672_v19 }
 0x326   : > { %v2755_v20 = vpop.eup %2754 }
 0x327   : > { %v1683_v22 = vmul.f32 %v2755_v20, %v3695_v59 }
 0x329   : > { %2528 = vmatmul.msk.f32.vlgmr.msrb.gmra.mxu1 %vm1527_vm3, %v1683_v22 }
 0x32b   : > { %v2757_v24 = vpop.eup %2756 }
 0x32c   : > { %v1675_v23 = vpop.xlane.xlu0 %1674  ;;  %v1684_v25 = vmul.f32 %v2757_v24, %v3699_v63 }
 0x32d   : > { %2758 = vrcp.f32 %v1675_v23 }
 0x32e   : > { %2529 = vmatmul.msk.f32.vlgmr.msrb.gmra.mxu2 %vm1527_vm3, %v1684_v25 }
 0x333   : > { %v2759_v26 = vpop.eup %2758 }
 0x334   : > { %v1685_v27 = vmul.f32 %v2759_v26, %v3703_v4  ;;  %v1678_v28 = vpop.xlane.xlu0 %1677 }
 0x335   : > { %2760 = vrcp.f32 %v1678_v28 }
 0x336   : > { %2530 = vmatmul.msk.f32.vlgmr.msra.gmra.mxu3 %vm1527_vm3, %v1685_v27 }
 0x33b   : > { %v2761_v29 = vpop.eup %2760 }
 0x33c   : > { %v1686_v30 = vmul.f32 %v2761_v29, %v3707_v12 }
 0x33e   : > { %2531 = vmatmul.msk.f32.vlgmr.msrb.gmra.mxu0 %vm1527_vm3, %v1686_v30 }
 0x3a6   : > { %v1707_v59 = vpop.f32.mrf.mxu1 }
 0x3a7   : > { %v1781_v33 = vrot.slane %v1707_v59, 4 }
 0x3b1   : > { %v1730_v31 = vpop.f32.mrf.mxu2 }
 0x3b2   : > { %v1793_v63 = vrot.slane %v1730_v31, 4 }
 0x3b9   : > { %v1753_v34 = vpop.f32.mrf.mxu3 }
 0x3ba   : > { %v1779_v35 = vrot.slane %v1753_v34, 4  ;;  %v1782_v36 = vsel %vm1177_vm2, %v1753_v34, %v1781_v33 }
 0x3bb   : > { %v1790_v37 = vperm.slane %v1782_v36, %v3585_v21  ;;  %v1776_v4 = vpop.f32.mrf.mxu0 }
 0x3bc   : > { %v1780_v38 = vsel %vm1177_vm2, %v1779_v35, %v1707_v59  ;;  %v1791_v39 = vrot.slane %v1776_v4, 4  ;;  %v1794_v40 = vsel %vm1177_vm2, %v1776_v4, %v1793_v63  ;;  %v2585_v63 = vld [vmem:[%s3492_s20 + $0x8] sm:$0xff]  ;;  %v2584_v35 = vld [vmem:[%s3492_s20] sm:$0xff] }
 0x3bd   : > { %v1786_v12 = vperm.slane %v1780_v38, %v3585_v21  ;;  %v1817_v41 = vrot.slane %v1790_v37, 4  ;;  %v1802_v42 = vperm.slane %v1794_v40, %v3585_v21  ;;  %1936 = vmatpush.bf16.msra.mxu1 %v2585_v63 }
 0x3be   : > { %v1792_v43 = vsel %vm1177_vm2, %v1791_v39, %v1730_v31 }
 0x3bf   : > { %v1805_v44 = vrot.slane %v1786_v12, 4  ;;  %v1798_v45 = vperm.slane %v1792_v43, %v3585_v21  ;;  %v1815_v46 = vrot.slane %v1802_v42, 4  ;;  %v1818_v47 = vsel %vm1177_vm2, %v1802_v42, %v1817_v41 }
 0x3c0   : > { %v1826_v48 = vperm.slane %v1818_v47, %v3591_v32 }
 0x3c1   : > { %v1803_v49 = vrot.slane %v1798_v45, 4  ;;  %v1806_v50 = vsel %vm1177_vm2, %v1798_v45, %v1805_v44  ;;  %v1816_v51 = vsel %vm1177_vm2, %v1815_v46, %v1790_v37  ;;  %1937 = vmatpush.bf16.msra.mxu1 %v2584_v35  ;;  %v3132_v46 = vmov 32.0  }
 0x3c2   : > { %v1814_v52 = vperm.slane %v1806_v50, %v3591_v32  ;;  %v1822_v53 = vperm.slane %v1816_v51, %v3591_v32  ;;  %v1833_v54 = vrot.slane %v1826_v48, 4  ;;  %2762 = vrcp.f32 %v3132_v46 }
 0x3c3   : > { %v1804_v55 = vsel %vm1177_vm2, %v1803_v49, %v1786_v12  ;;  %v2739_v12 = vld [vmem:[%s4034_s22] ss:$0 sm:$0xff] }
 0x3c4   : > { %v1810_v56 = vperm.slane %v1804_v55, %v3591_v32  ;;  %v1829_v57 = vrot.slane %v1814_v52, 4  ;;  %v1831_v58 = vrot.slane %v1822_v53, 4  ;;  %v1834_v60 = vsel %vm1177_vm2, 0.0, %v1833_v54 }
 0x3c5   : > { %v1846_v61 = vsel %vm1177_vm2, %v1833_v54, %v1822_v53  ;;  %v1851_v62 = vrot.slane %v1834_v60, 4  ;;  %v2591_v60 = vld [vmem:[%s3545_s21 + $0x18] sm:$0xff] }
 0x3c6   : > { %v1827_v6 = vrot.slane %v1810_v56, 4  ;;  %v1830_v0 = vsel %vm1177_vm2, 0.0, %v1829_v57  ;;  %v1832_v1 = vsel %vm1177_vm2, 0.0, %v1831_v58  ;;  %v1850_v2 = vperm.slane %v1846_v61, %v3585_v21  ;;  %v2586_v58 = vld [vmem:[%s3499_s24] sm:$0xff]  ;;  %2066 = vmatpush.bf16.msrb.mxu3 %v2591_v60 }
 0x3c7   : > { %v1840_v3 = vrot.slane %v1830_v0, 4  ;;  %v1835_v7 = vsel %vm1177_vm2, %v1829_v57, %v1810_v56  ;;  %v1852_v8 = vsel %vm1177_vm2, %v1851_v62, %v1832_v1  ;;  %v2587_v57 = vld [vmem:[%s3499_s24 + $0x8] sm:$0xff] }
 0x3c8   : > { %v1828_v9 = vsel %vm1177_vm2, 0.0, %v1827_v6  ;;  %v1839_v10 = vperm.slane %v1835_v7, %v3585_v21  ;;  %v1856_v11 = vperm.slane %v1852_v8, %v3585_v21  ;;  %v1871_v13 = vrot.slane %v1850_v2, 4  ;;  %v2763_v47 = vpop.eup %2762  ;;  %2013 = vmatpush.bf16.msra.mxu2 %v2587_v57  ;;  %v2590_v6 = vld [vmem:[%s3545_s21 + $0x10] sm:$0xff] }
 0x3c9   : > { %v1841_v14 = vsel %vm1177_vm2, %v1840_v3, %v1828_v9  ;;  %v1950_v48 = vmul.f32 32.0, %v2763_v47  ;;  %vm1954_vm6 = vweird.f32 %v2763_v47 }
 0x3ca   : > { %v1845_v15 = vperm.slane %v1841_v14, %v3585_v21  ;;  %v1859_v16 = vrot.slane %v1839_v10, 4  ;;  %v1872_v17 = vsel %vm1177_vm2, %v1856_v11, %v1871_v13  ;;  %v1869_v18 = vrot.slane %v1856_v11, 4  ;;  %2067 = vmatpush.bf16.msrb.mxu3 %v2590_v6  ;;  %v2741_v13 = vld [vmem:[%s4036_s14] ss:$0 sm:$0xff] }
 0x3cb   : > { %v1880_v19 = vperm.slane %v1872_v17, %v3591_v32  ;;  %v1951_v49 = vsub.f32 1.0, %v1950_v48 }
 0x3cc   : > { %v1860_v20 = vsel %vm1177_vm2, %v1845_v15, %v1859_v16  ;;  %v1857_v22 = vrot.slane %v1845_v15, 4  ;;  %v1870_v24 = vsel %vm1177_vm2, %v1869_v18, %v1850_v2  ;;  %2014 = vmatpush.bf16.msra.mxu2 %v2586_v58  ;;  %v2589_v18 = vld [vmem:[%s3545_s21 + $0x8] sm:$0xff] }
 0x3cd   : > { %v1868_v23 = vperm.slane %v1860_v20, %v3591_v32  ;;  %v1885_v25 = vrot.slane %v1880_v19, 4  ;;  %v1876_v26 = vperm.slane %v1870_v24, %v3591_v32  ;;  %v1952_v50 = vmul.f32 %v2763_v47, %v1951_v49  ;;  %v2742_v20 = vld [vmem:[%s1040_s19] ss:$0 sm:$0xff] }
 0x3ce   : > { %v1858_v27 = vsel %vm1177_vm2, %v1857_v22, %v1839_v10  ;;  %v2740_v10 = vld [vmem:[%s1037_s3] ss:$0 sm:$0xff]  ;;  %2068 = vmatpush.bf16.msrb.mxu3 %v2589_v18 }
 0x3cf   : > { %v1886_v21 = vsel %vm1177_vm2, %v1885_v25, %v1868_v23  ;;  %v1887_v28 = vrot.slane %v1868_v23, 4  ;;  %v1864_v29 = vperm.slane %v1858_v27, %v3591_v32  ;;  %v1881_v30 = vrot.slane %v1876_v26, 4  ;;  %v2743_v27 = vld [vmem:[%s1048_s28] ss:$0 sm:$0xff] }
 0x3d0   : > { %1894 = vrot.lane.b32.xlu0 %v1886_v21, %s3129_s12  ;;  %v1953_v51 = vadd.f32 %v2763_v47, %v1952_v50 }
 0x3d1   : > { %v1888_v59 = vsel %vm1177_vm2, %v1880_v19, %v1887_v28  ;;  %v1883_v31 = vrot.slane %v1864_v29, 4  ;;  %v1882_v33 = vsel %vm1177_vm2, %v1881_v30, %v1864_v29  ;;  %v2588_v19 = vld [vmem:[%s3545_s21] sm:$0xff] }
 0x3d2   : > { %1898 = vrot.lane.b32.xlu2 %v1888_v59, %s3130_s17  ;;  %v3810_v52 = vsel %vm1954_vm6, %v2763_v47, %v1953_v51  ;;  %2069 = vmatpush.bf16.msrb.mxu3 %v2588_v19 }
 0x3d3   : > { %v1884_v34 = vsel %vm1177_vm2, %v1876_v26, %v1883_v31 }
 0x3d4   : > { %1890 = vrot.lane.b32.xlu1 %v1884_v34, %s3131_s27 }
 0x42c   : > { %v1899_v4 = vpop.permute.xlu2 %1898 }
 0x442   : > { %v1895_v36 = vpop.permute.xlu0 %1894 }
 0x446   : > { %v1891_v32 = vpop.permute.xlu1 %1890 }
 0x447   : > { %v1901_v37 = vsel %vm1527_vm3, %v1882_v33, %v1891_v32 }
 0x448   : > { %v1903_v38 = vsel %vm1902_vm4, %v1901_v37, %v1895_v36 }
 0x449   : > { %v1905_v39 = vsel %vm1904_vm5, %v1903_v38, %v1899_v4 }
 0x44a   : > { %v1906_v40 = vpack.c.bf16 %v1905_v39, %v1905_v39 }
 0x44c   : > { %2540 = vmatmul.msk.bf16.vlgmr.msra.gmra.mxu1 %vm1083_vm1, %v1906_v40 }
 0x4c9   : > { %v1939_v41 = vpop.f32.mrf.mxu1 }
 0x4ca   : > { %v1940_v42 = vadd.f32 %v2739_v12, %v1939_v41 }
 0x4cc   : > { %v1943_v43 = vadd.f32 %v1940_v42, %v3562_v5  ;;  %v2744_v42 = vld [vmem:[%s1051_s23] ss:$0 sm:$0xff]  ;;  %s4041_s23 = sld [smem:[#allocation56_spill]] (!%p2567_p12) }
 0x4ce   : > { %v1946_v44 = vsel %vm1083_vm1, %v1943_v43, 0.0 }
 0x4cf   : > { %1947 = vadd.xlane.f32.xlu0 %v1946_v44  ;;  %v2745_v44 = vld [vmem:[%s886_s4] ss:$0 sm:$0xff] }
 0x4d1   : > { %v1941_v45 = vpop.f32.mrf.mxu1 }
 0x542   : > { %v1948_v53 = vpop.xlane.xlu0 %1947 }
 0x543   : > { %v1956_v5 = vmul.f32 %v3810_v52, %v1948_v53 }
 0x545   : > { %v1957_v54 = vsub.f32 %v1943_v43, %v1956_v5 }
 0x547   : > { %v1958_v55 = vmul.f32 %v1957_v54, %v1957_v54 }
 0x549   : > { %v1959_v56 = vsel %vm1083_vm1, %v1958_v55, 0.0 }
 0x54a   : > { %1960 = vadd.xlane.f32.xlu1 %v1959_v56 }
 0x5bd   : > { %v1961_v61 = vpop.xlane.xlu1 %1960 }
 0x5be   : > { %v1962_v62 = vmul.f32 %v1961_v61, %v3810_v52 }
 0x5c0   : > { %v1963_v0 = vadd.f32 1e-05, %v1962_v62 }
 0x5c2   : > { %2764 = vrsqrt.f32 %v1963_v0  ;;  %vm1970_vm8 = vweird.f32 %v1963_v0 }
 0x5c8   : > { %v2765_v1 = vpop.eup %2764 }
 0x5c9   : > { %v1965_v2 = vmul.f32 %v2765_v1, %v1963_v0  ;;  %vm1971_vm7 = vweird.f32 %v2765_v1 }
 0x5ca   : > { %vm1972_vm9 = vmor %vm1970_vm8, %vm1971_vm7 }
 0x5cb   : > { %v1966_v3 = vmul.f32 %v2765_v1, %v1965_v2 }
 0x5cd   : > { %v1967_v7 = vmul.f32 0.5, %v1966_v3 }
 0x5cf   : > { %v1968_v8 = vsub.f32 1.5, %v1967_v7 }
 0x5d1   : > { %v1969_v9 = vmul.f32 %v2765_v1, %v1968_v8 }
 0x5d3   : > { %v1973_v11 = vsel %vm1972_vm9, %v2765_v1, %v1969_v9 }
 0x5d4   : > { %v1974_v14 = vmul.f32 %v1973_v11, %v1957_v54 }
 0x5d6   : > { %v1978_v15 = vmul.f32 %v2740_v10, %v1974_v14 }
 0x5d8   : > { %v1982_v16 = vadd.f32 %v2741_v13, %v1978_v15 }
 0x5da   : > { %v1983_v17 = vpack.c.bf16 %v1982_v16, %v1982_v16 }
 0x5dc   : > { %2549 = vmatmul.msk.bf16.vlgmr.msra.gmra.mxu2 %vm1083_vm1, %v1983_v17 }
 0x65f   : > { %v2016_v22 = vpop.f32.mrf.mxu2 }
 0x660   : > { %v2017_v24 = vadd.f32 %v2742_v20, %v2016_v22 }
 0x662   : > { %v2020_v23 = vmax.f32 %v2017_v24, 0.0 }
 0x664   : > { %v2021_v25 = vpack.c.bf16 %v2020_v23, %v2020_v23 }
 0x666   : > { %2566 = vmatmul.msk.bf16.vlgmr.msrb.gmra.mxu3 %vm2058_vm10, %v2021_v25 }
 0x667   : > { %v2018_v26 = vpop.f32.mrf.mxu2 }
 0x6e9   : > { %v2071_v21 = vpop.f32.mrf.mxu3 }
 0x6ea   : > { %v2072_v28 = vadd.f32 %v2743_v27, %v2071_v21 }
 0x6ec   : > { %v2075_v29 = vadd.f32 %v2072_v28, %v1982_v16 }
 0x6ee   : > { %v2078_v30 = vsel %vm1083_vm1, %v2075_v29, 0.0 }
 0x6ef   : > { %2079 = vadd.xlane.f32.xlu2 %v2078_v30 }
 0x6f1   : > { %v2073_v59 = vpop.f32.mrf.mxu3 }
 0x762   : > { %v2080_v31 = vpop.xlane.xlu2 %2079 }
 0x763   : > { %v2081_v33 = vmul.f32 %v2080_v31, %v3810_v52 }
 0x765   : > { %v2082_v34 = vsub.f32 %v2075_v29, %v2081_v33 }
 0x767   : > { %v2083_v63 = vmul.f32 %v2082_v34, %v2082_v34 }
 0x769   : > { %v2084_v35 = vsel %vm1083_vm1, %v2083_v63, 0.0 }
 0x76a   : > { %2085 = vadd.xlane.f32.xlu0 %v2084_v35 }
 0x7dd   : > { %v2086_v32 = vpop.xlane.xlu0 %2085 }
 0x7de   : > { %v2087_v36 = vmul.f32 %v2086_v32, %v3810_v52 }
 0x7e0   : > { %v2088_v37 = vadd.f32 1e-05, %v2087_v36 }
 0x7e2   : > { %2766 = vrsqrt.f32 %v2088_v37  ;;  %vm2095_vm12 = vweird.f32 %v2088_v37 }
 0x7e8   : > { %v2767_v4 = vpop.eup %2766 }
 0x7e9   : > { %v2090_v38 = vmul.f32 %v2767_v4, %v2088_v37  ;;  %vm2096_vm11 = vweird.f32 %v2767_v4 }
 0x7ea   : > { %vm2097_vm13 = vmor %vm2095_vm12, %vm2096_vm11 }
 0x7eb   : > { %v2091_v39 = vmul.f32 %v2767_v4, %v2090_v38 }
 0x7ed   : > { %v2092_v40 = vmul.f32 0.5, %v2091_v39 }
 0x7ef   : > { %v2093_v12 = vsub.f32 1.5, %v2092_v40 }
 0x7f1   : > { %v2094_v41 = vmul.f32 %v2767_v4, %v2093_v12 }
 0x7f3   : > { %v2098_v43 = vsel %vm2097_vm13, %v2767_v4, %v2094_v41 }
 0x7f4   : > { %v2099_v45 = vmul.f32 %v2098_v43, %v2082_v34 }
 0x7f6   : > { %v2103_v46 = vmul.f32 %v2744_v42, %v2099_v45  ;;  %2112 = sbr.rel (%p2567_p12) target bundleno = 2312 (0x908), region = 136 }
 0x7f8   : > { %v2107_v47 = vadd.f32 %v2745_v44, %v2103_v46 }
 0x7fa   : > { %2108 = vst.msk [vmem:[#allocation2] sm:$0xff] %vm1083_vm1, %v2107_v47 }
 0x7fb   : > { %v2115_v48 = vsel %vm1083_vm1, %v2107_v47, 0.0  ;;  %v2768_v0 = vld [vmem:[%s4041_s23] ss:$0 sm:$0xff] }
 0x7fc   : > { %2116 = vadd.xlane.f32.xlu0 %v2115_v48 }
 0x86f   : > { %v2117_v49 = vpop.xlane.xlu0 %2116 }
 0x870   : > { %v2118_v50 = vmul.f32 %v2117_v49, %v3810_v52 }
 0x872   : > { %v2119_v51 = vsub.f32 %v2107_v47, %v2118_v50 }
 0x874   : > { %v2120_v53 = vmul.f32 %v2119_v51, %v2119_v51 }
 0x876   : > { %v2121_v5 = vsel %vm1083_vm1, %v2120_v53, 0.0 }
 0x877   : > { %2122 = vadd.xlane.f32.xlu0 %v2121_v5 }
 0x8ea   : > { %v2123_v54 = vpop.xlane.xlu0 %2122 }
 0x8eb   : > { %v2124_v55 = vmul.f32 %v2123_v54, %v3810_v52  ;;  %v2769_v52 = vld [vmem:[%s4042_s6] ss:$0 sm:$0xff] }
 0x8ed   : > { %v2125_v56 = vadd.f32 1e-05, %v2124_v55 }
 0x8ef   : > { %2770 = vrsqrt.f32 %v2125_v56  ;;  %vm2132_vm15 = vweird.f32 %v2125_v56 }
 0x8f5   : > { %v2771_v57 = vpop.eup %2770 }
 0x8f6   : > { %v2127_v58 = vmul.f32 %v2771_v57, %v2125_v56  ;;  %vm2133_vm14 = vweird.f32 %v2771_v57 }
 0x8f7   : > { %vm2134_vm0 = vmor %vm2132_vm15, %vm2133_vm14 }
 0x8f8   : > { %v2128_v60 = vmul.f32 %v2771_v57, %v2127_v58 }
 0x8fa   : > { %v2129_v61 = vmul.f32 0.5, %v2128_v60 }
 0x8fc   : > { %v2130_v62 = vsub.f32 1.5, %v2129_v61 }
 0x8fe   : > { %v2131_v6 = vmul.f32 %v2771_v57, %v2130_v62 }
 0x900   : > { %v2135_v1 = vsel %vm2134_vm0, %v2771_v57, %v2131_v6 }
 0x901   : > { %v2136_v2 = vmul.f32 %v2135_v1, %v2119_v51 }
 0x903   : > { %v2140_v3 = vmul.f32 %v2768_v0, %v2136_v2 }
 0x905   : > { %v2144_v7 = vadd.f32 %v2769_v52, %v2140_v3 }
 0x907   : > { %2145 = vst.msk [vmem:[%s3558_s5] sm:$0xff] %vm1083_vm1, %v2144_v7 }
 0x908 PF: > { %s4043_s16 = sld [smem:[#allocation28_spill]]  ;;  %s2159_s7 = sshll.u32 %s3558_s5, 4  ;;  %s2160_s7 = int_to_ptr.vmem [resolvable:$true] %s2159_s7 }
 0x909   : > { %s4045_s8 = sld [smem:[#allocation58_spill]]  ;;  %s2147_s20 = scalar_lea.sflag [#allocation5], %s3465_s18 }
 0x90e   : > { %s2569_s12 = sshll.u32 %s4043_s16, 3 }
 0x90f   : > { %s2157_s10 = scalar_lea.hbm %s4045_s8, %s2569_s12  ;;  %s3002_s1 = scalar_lea.hbm %s4045_s8, 16 }
 0x910   : > { %s2161_s22 = sshll.u32 %s2157_s10, 4  ;;  %s2162_s22 = int_to_ptr.hbm [resolvable:$true] %s2161_s22 }
 0x911   : > { %s2996_s24 = sshra.s32 %s2162_s22, 4  ;;  %s2997_s24 = int_to_ptr.hbm [resolvable:$true] %s2996_s24 }
 0x912   : > { %s2998_s2 = scalar_lea.hbm %s2997_s24, 8  ;;  %p3003_p2 = scmp.lt.s32.totalorder %s2997_s24, %s4045_s8 }
 0x913   : > { %p2999_p13 = scmp.ne.s32.totalorder %s2997_s24, %s2998_s2  ;;  %p3004_p6 = scmp.lt.s32.totalorder %s3002_s1, %s2998_s2 }
 0x915   : > { %p3000_p0 = pnand %p2999_p13, %p3361_p8  ;;  %p3005_p1 = por %p3004_p6, %p3003_p2 }
 0x917   : > { %p3001_p5 = pneg %p3000_p0 }
 0x919   : > { %p3006_p3 = pnand %p3005_p1, %p3001_p5 }
 0x91b   : > { %3009 = shalt.err (!%p3006_p3)
}
 0x91c   : > { %2606 = dma.vmem_to_hbm [thread:$0]  (%p3361_p8), %s2160_s7, 128, %s2162_s22, %s2147_s20  }
 0x91d PF: > { %s4046_s18 = sld [smem:[#allocation31_spill]] }
 0x91e   : > { %s4047_s5 = sld [smem:[#allocation24_spill]] }
 0x923   : > { %p2635_p10 = scmp.ge.s32.totalorder %s4046_s18, 2 }
 0x924   : > { %s2173_s29 = sand.u32 1, %s4047_s5  }
 0x925   : > { %p2631_p11 = pnand %p2635_p10, %p3368_p9  ;;  %s2174_s28 = scalar_lea.sflag [#allocation5], %s2173_s29 }
 0x927   : > { %p2632_p4 = pneg %p2631_p11 }
 0x929   : > { %3075 = dma.done.wait (%p2632_p4), %s2174_s28, 128  }
 0x92a   : > { %3077 = vsyncadd (%p2632_p4), %s2174_s28, 4294967168  ;;  %s45_s4 = sadd.s32 1, %s4046_s18   ;;  %s4049_s1 = sld [smem:[#allocation22_spill]] }
 0x92b   : > { %p42_p7 = scmp.ge.s32.totalorder %s45_s4, 6   ;;  %s4050_s22 = sld [smem:[#allocation23_spill]] }
 0x92c   : > { %s4051_s23 = sld [smem:[#allocation34_spill]] }
 0x92d   : > { %s4052_s24 = sld [smem:[#allocation25_spill]] }
 0x92e   : > { %s4053_s2 = sld [smem:[#allocation26_spill]] }
 0x92f   : > { %s4054_s25 = sld [smem:[#allocation35_spill]]  ;;  %44 = sbr.rel (!%p42_p7) target bundleno = 37 (0x25), region = 258 }
 0x930   : > { %s4055_s3 = sld [smem:[#allocation29_spill]] }
 0x931   : > { %s4056_s26 = sld [smem:[#allocation30_spill]] }
 0x932   : > { %s4057_s27 = sld [smem:[#allocation32_spill]] }
 0x933   : > { %s4058_s28 = sld [smem:[#allocation33_spill]] }
 0x934   :  { %2180 = vsyncpa [#allocation4], 1 }
 0x935   :  { %2182 = vsyncpa [#allocation4 + $0x1], 1 }
 0x936   :  { %2183 = vsyncpa [#allocation7], 1 }
 0x937   :  { %2185 = vsyncpa [#allocation7 + $0x1], 1 }
 0x938   :  { %2186 = vsyncpa [#allocation10], 1 }
 0x939   :  { %2188 = vsyncpa [#allocation10 + $0x1], 1 }
 0x93a   :  { %2189 = vsyncpa [#allocation13], 1 }
 0x93b   :  { %2191 = vsyncpa [#allocation13 + $0x1], 1 }
 0x93c   :  { %2192 = vsyncpa [#allocation5], 1 }
 0x93d   :  { %2194 = vsyncpa [#allocation5 + $0x1], 1 }

</bundles_post_ra>
